<compile_context>
chip_gen: v7x
topology: tpu7x:2x2x1
jax: 0.10.0
libtpu: 0.0.40
codegen_flags: <defaults>
</compile_context>

<pallas_src>
import math

import jax
import jax.numpy as jnp
from jax import lax
from jax.experimental import pallas as pl
from jax.experimental.pallas import tpu as pltpu

# ----------------------------- hyper-parameters ------------------------------
N_BATCH = 2          # n
WINDOW = 8           # window_size (t)
N_FEAT = 4           # n_features (C)
IMG_H = 16
IMG_W = 16
PATCH_H = 4
PATCH_W = 4
D_MODEL = 32
D_VALUE = 32
N_HEAD_T = 4         # n_head_temporal
N_HEAD_S = 4         # n_head_spatial
SCALING_FACTOR = 0.5  # scaling_factor_weights (xavier gain for v_layer / w_h)

BN_EVAL_SCALE = 1.0 / math.sqrt(1.0 + 1e-5)  # eval BatchNorm, running var = 1
LANE = 128

N_PATCHES = (IMG_H // PATCH_H) * (IMG_W // PATCH_W)        # 16
K_PATCH = N_FEAT * PATCH_H * PATCH_W                       # 64

# row offsets inside the packed bf16 weight slab (all multiples of 16)
R_RHS_S = K_PATCH                                          # 64
R_WH_T = R_RHS_S + D_MODEL                                 # 96
R_WH_S = R_WH_T + LANE                                     # 224
R_TOTAL_W = R_WH_S + LANE                                  # 352

# row offsets inside the packed f32 constants slab (all multiples of 8)
R_BIAS_S = WINDOW                                          # 8
R_VEC_T = R_BIAS_S + N_PATCHES                             # 24
R_VEC_S = R_VEC_T + 8                                      # 32
R_TOTAL_V = R_VEC_S + 8                                    # 40


# ------------------------------ fused Pallas kernel ---------------------------
def _encoder_kernel(patches_ref, w_ref, v_ref, attn_t_ref, main_ref):
    """Whole Encoder forward in ONE grid step (batch flattened into GEMM rows)."""
    D, T, P, N = D_MODEL, WINDOW, N_PATCHES, N_BATCH
    H = N_HEAD_T                     # == N_HEAD_S
    NP = N * P

    def attn_stage(slab3, token, bh, gamma, beta, wh_pad):
        """slab3: (B, S, 128) f32; lanes [0,H)=per-head scaled scores (q folded),
        lanes [H,H+D)=values, rest zero.  Returns (y (B,D), avg_attn (B,S))."""
        scores = slab3[:, :, 0:H]                               # (B, S, H)
        m = jnp.max(scores, axis=1, keepdims=True)              # (B, 1, H)
        p = jnp.exp(scores - m)                                 # (B, S, H)
        l = jnp.sum(p, axis=1, keepdims=True)                   # (B, 1, H)
        # exact normalizer (tiny array) + head-average folded into one scale
        inv_l = (1.0 / H) / l                                   # (B, 1, H)
        avg_attn = jnp.sum(p * inv_l, axis=-1)                  # (B, S)

        attended = jnp.sum(avg_attn[:, :, None] * slab3, axis=1)   # (B, 128)
        out = jnp.dot(attended.astype(jnp.bfloat16), wh_pad,
                      preferred_element_type=jnp.float32) + bh     # (B, D)

        # residual with the learnable token (the query), then LayerNorm (f32)
        y = token + out
        mu = jnp.mean(y, axis=-1, keepdims=True)
        var = jnp.mean((y - mu) ** 2, axis=-1, keepdims=True)
        y = (y - mu) * lax.rsqrt(var + 1e-5) * gamma + beta
        return y, avg_attn

    # packed bf16 weights (static, aligned slices)
    w_patch = w_ref[0:K_PATCH, :]                   # (64, 128)  conv ⊗ temporal RHS
    rhs_s = w_ref[R_RHS_S:R_RHS_S + D, :]           # (32, 128)  spatial RHS
    wh_t = w_ref[R_WH_T:R_WH_T + LANE, 0:D]         # (128, 32)  row-padded w_h (temporal)
    wh_s = w_ref[R_WH_S:R_WH_S + LANE, 0:D]         # (128, 32)  row-padded w_h (spatial)

    # packed f32 constants
    bias_t = v_ref[0:T, :]                          # (8, 128)   PE_t/conv_b/biases folded
    bias_s = v_ref[R_BIAS_S:R_BIAS_S + P, :]        # (16, 128)  PE_s/biases folded
    vt = v_ref[R_VEC_T:R_VEC_T + 4, 0:D]            # rows: token, b_h, gamma, beta
    vs = v_ref[R_VEC_S:R_VEC_S + 4, 0:D]

    # ---- temporal attention over the window (patch-embed GEMM folded in) ----
    slab_t = jnp.dot(patches_ref[...], w_patch,
                     preferred_element_type=jnp.float32)            # (NP*T, 128)
    slab_t = slab_t.reshape(NP, T, LANE) + bias_t[None, :, :]
    y_t, attn_t = attn_stage(slab_t, vt[0:1], vt[1:2], vt[2:3], vt[3:4], wh_t)
    attn_t_ref[...] = attn_t                                          # (NP, T)

    # ---- spatial attention over the patch grid (spatial PE folded in) ----
    slab_s = jnp.dot(y_t.astype(jnp.bfloat16), rhs_s,
                     preferred_element_type=jnp.float32)              # (NP, 128)
    slab_s = slab_s.reshape(N, P, LANE) + bias_s[None, :, :]
    y_s, attn_s = attn_stage(slab_s, vs[0:1], vs[1:2], vs[2:3], vs[3:4], wh_s)

    # lane-packed main output: lanes [0,D)=y, [D,D+P)=spatial attention
    main_ref[...] = jnp.zeros((N, LANE), jnp.float32)
    main_ref[:, 0:D] = y_s
    main_ref[:, D:D + P] = attn_s


# ------------------------- positional encodings (init) ------------------------
def positional_encoding_1d(S, D):
    pos = jnp.arange(S, dtype=jnp.float32)[:, None]
    div = jnp.exp(jnp.arange(0, D, 2, dtype=jnp.float32) * (-math.log(10000.0) / D))
    pe = jnp.zeros((S, D), jnp.float32)
    pe = pe.at[:, 0::2].set(jnp.sin(pos * div))
    pe = pe.at[:, 1::2].set(jnp.cos(pos * div))
    return pe


def positional_encoding_2d(Hh, Ww, D):
    dh = D // 2
    div = jnp.exp(jnp.arange(0, dh, 2, dtype=jnp.float32) * (-math.log(10000.0) / dh))
    pos_w = jnp.arange(Ww, dtype=jnp.float32)[:, None]
    pos_h = jnp.arange(Hh, dtype=jnp.float32)[:, None]
    pe = jnp.zeros((Hh, Ww, D), jnp.float32)
    pe = pe.at[:, :, 0:dh:2].set(jnp.broadcast_to(jnp.sin(pos_w * div)[None], (Hh, Ww, dh // 2)))
    pe = pe.at[:, :, 1:dh:2].set(jnp.broadcast_to(jnp.cos(pos_w * div)[None], (Hh, Ww, dh // 2)))
    pe = pe.at[:, :, dh::2].set(jnp.broadcast_to(jnp.sin(pos_h * div)[:, None], (Hh, Ww, dh // 2)))
    pe = pe.at[:, :, dh + 1::2].set(jnp.broadcast_to(jnp.cos(pos_h * div)[:, None], (Hh, Ww, dh // 2)))
    return pe


# ------------------------------ parameter init --------------------------------
def _xavier_uniform(key, shape, gain=1.0):
    a = gain * math.sqrt(6.0 / (shape[0] + shape[1]))
    return jax.random.uniform(key, shape, jnp.float32, minval=-a, maxval=a)


def _fold_attn_stage(key, gain_v, n_head):
    """Raw TFT-style attention params -> folded lane-dense operands."""
    kk = jax.random.split(key, 5)
    wq = _xavier_uniform(kk[0], (D_MODEL, D_MODEL))
    wk = _xavier_uniform(kk[1], (D_MODEL, D_MODEL))
    wv = _xavier_uniform(kk[2], (D_MODEL, D_VALUE), gain_v)     # v_layer
    wh = _xavier_uniform(kk[3], (D_VALUE, D_MODEL), gain_v)     # w_h
    token = jax.random.normal(kk[4], (D_MODEL,), jnp.float32) / math.sqrt(D_MODEL)
    bq = bk = bv = jnp.zeros((D_MODEL,), jnp.float32)
    bh = jnp.zeros((D_MODEL,), jnp.float32)
    gamma = jnp.ones((D_MODEL,), jnp.float32)
    beta = jnp.zeros((D_MODEL,), jnp.float32)

    # fold the constant query into the score projection:
    #   score_h(x) = (x@wk + bk) . (q masked to head h) / sqrt(dk)
    dk = D_MODEL // n_head
    scale = 1.0 / math.sqrt(dk)
    q = token @ wq + bq                                          # (D,)
    head_of = jnp.arange(D_MODEL) // dk
    q_mask = jnp.where(head_of[:, None] == jnp.arange(n_head)[None, :],
                       q[:, None] * scale, 0.0)                  # (D, H)
    w_score = wk @ q_mask                                        # (D, H)
    b_score = bk @ q_mask                                        # (H,)

    rhs = jnp.zeros((D_MODEL, LANE), jnp.float32)
    rhs = rhs.at[:, 0:n_head].set(w_score)
    rhs = rhs.at[:, n_head:n_head + D_VALUE].set(wv)
    bias_base = jnp.zeros((LANE,), jnp.float32)
    bias_base = bias_base.at[0:n_head].set(b_score)
    bias_base = bias_base.at[n_head:n_head + D_VALUE].set(bv)

    wh_pad = jnp.zeros((LANE, D_MODEL), jnp.float32)
    wh_pad = wh_pad.at[n_head:n_head + D_VALUE, :].set(wh)       # zero rows elsewhere

    vecs = jnp.stack([token, bh, gamma, beta])                   # (4, D)
    return rhs, bias_base, wh_pad, vecs


def init_params(key):
    assert D_VALUE == D_MODEL and N_HEAD_T == N_HEAD_S
    k0, k1, k2 = jax.random.split(key, 3)

    # conv patch-embed weight: kaiming_normal(fan_out), repeat kernel col 0,
    # eval-BN scale folded in; bias is zero.
    fan_out = D_MODEL * PATCH_H * PATCH_W
    std = math.sqrt(2.0 / fan_out)
    w = std * jax.random.normal(k0, (D_MODEL, N_FEAT, PATCH_H, PATCH_W), jnp.float32)
    w = jnp.repeat(w[:, :, :, 0:1], PATCH_W, axis=-1)
    conv_w = w.reshape(D_MODEL, K_PATCH).T * BN_EVAL_SCALE       # (K, D)
    conv_b = jnp.zeros((D_MODEL,), jnp.float32)

    Ph, Pw = IMG_H // PATCH_H, IMG_W // PATCH_W
    P = Ph * Pw
    pe_t = positional_encoding_1d(WINDOW, D_MODEL)               # (T, D)
    pe_s = positional_encoding_2d(Ph, Pw, D_MODEL).reshape(P, D_MODEL)

    rhs_t, bias0_t, wh_t, vec_t = _fold_attn_stage(k1, SCALING_FACTOR, N_HEAD_T)
    rhs_s, bias0_s, wh_s, vec_s = _fold_attn_stage(k2, SCALING_FACTOR, N_HEAD_S)

    # fold conv patch-embed + temporal PE into the temporal projection,
    # spatial PE into the spatial bias rows.
    w_patch = conv_w @ rhs_t                                     # (K, 128)
    bias_t = pe_t @ rhs_t + (conv_b @ rhs_t)[None, :] + bias0_t[None, :]   # (T, 128)
    bias_s = pe_s @ rhs_s + bias0_s[None, :]                     # (P, 128)

    # one bf16 weight slab (all slice offsets multiples of 16)
    big_w = jnp.zeros((R_TOTAL_W, LANE), jnp.float32)
    big_w = big_w.at[0:K_PATCH, :].set(w_patch)
    big_w = big_w.at[R_RHS_S:R_RHS_S + D_MODEL, :].set(rhs_s)
    big_w = big_w.at[R_WH_T:R_WH_T + LANE, 0:D_MODEL].set(wh_t)
    big_w = big_w.at[R_WH_S:R_WH_S + LANE, 0:D_MODEL].set(wh_s)

    # one f32 constants slab (all slice offsets multiples of 8)
    big_v = jnp.zeros((R_TOTAL_V, LANE), jnp.float32)
    big_v = big_v.at[0:WINDOW, :].set(bias_t)
    big_v = big_v.at[R_BIAS_S:R_BIAS_S + P, :].set(bias_s)
    big_v = big_v.at[R_VEC_T:R_VEC_T + 4, 0:D_MODEL].set(vec_t)
    big_v = big_v.at[R_VEC_S:R_VEC_S + 4, 0:D_MODEL].set(vec_s)

    return dict(weights=big_w.astype(jnp.bfloat16), consts=big_v)


# ------------------------------- encoder forward -------------------------------
def encoder_forward(x, params):
    # x: (N, T, C, H, W)
    N, T, C, Hh, Ww = x.shape
    Ph, Pw = Hh // PATCH_H, Ww // PATCH_W
    P = Ph * Pw
    D = D_MODEL
    K = C * PATCH_H * PATCH_W

    # Patching: crop + unfold.  Rows ordered (n, ph, pw, t) so the PyTorch
    # movedim(-4, -2) becomes a free reshape inside the fused kernel.
    x = x[:, :, :, :Ph * PATCH_H, :Pw * PATCH_W]
    patches = x.reshape(N, T, C, Ph, PATCH_H, Pw, PATCH_W)
    patches = patches.transpose(0, 3, 5, 1, 2, 4, 6)        # (N,Ph,Pw,T,C,ph,pw)
    patches = patches.reshape(N * P * T, K).astype(jnp.bfloat16)

    attn_t, packed = pl.pallas_call(
        _encoder_kernel,
        out_shape=(jax.ShapeDtypeStruct((N * P, T), jnp.float32),
                   jax.ShapeDtypeStruct((N, LANE), jnp.float32)),
        grid_spec=pltpu.PrefetchScalarGridSpec(
            num_scalar_prefetch=0,
            grid=(1,),                                   # single TC step, batch in M
            in_specs=[
                pl.BlockSpec((N * P * T, K), lambda i: (0, 0)),       # patches
                pl.BlockSpec((R_TOTAL_W, LANE), lambda i: (0, 0)),    # bf16 weight slab
                pl.BlockSpec((R_TOTAL_V, LANE), lambda i: (0, 0)),    # f32 constants slab
            ],
            out_specs=(pl.BlockSpec((N * P, T), lambda i: (0, 0)),    # temporal attention
                       pl.BlockSpec((N, LANE), lambda i: (0, 0)))),   # y | spatial attn
        compiler_params=pltpu.CompilerParams(
            dimension_semantics=("arbitrary",)),
    )(patches, params['weights'], params['consts'])

    y = packed[:, 0:D]                                           # (N, D)
    attn_s = packed[:, D:D + P].reshape(N, 1, P)                 # (N, 1, P)
    return y, {'spat_attn': attn_s,
               'temp_attn': attn_t.reshape(N * P, 1, T)}         # (N*P, 1, T)


# ------------------------------------ main ------------------------------------
if __name__ == "__main__":
    key = jax.random.PRNGKey(0)
    kx, kp = jax.random.split(key)
    x = jax.random.normal(kx, (N_BATCH, WINDOW, N_FEAT, IMG_H, IMG_W), jnp.float32)
    params = init_params(kp)

    fwd = jax.jit(encoder_forward)
    y, attns = fwd(x, params)
    jax.block_until_ready(y)
    jax.block_until_ready(attns)

    Ph, Pw = IMG_H // PATCH_H, IMG_W // PATCH_W
    assert y.shape == (N_BATCH, D_MODEL)
    assert attns['spat_attn'].shape == (N_BATCH, 1, Ph * Pw)
    assert attns['temp_attn'].shape == (N_BATCH * Ph * Pw, 1, WINDOW)
    assert bool(jnp.all(jnp.isfinite(y)))
    # attention weights are a valid distribution over the attended axis
    # (normalizer is now exact, so a tight tolerance holds)
    assert bool(jnp.allclose(attns['spat_attn'].sum(-1), 1.0, atol=1e-3))
    assert bool(jnp.allclose(attns['temp_attn'].sum(-1), 1.0, atol=1e-3))

    print("KERNEL_OK")
</pallas_src>

<mosaic_0001>
module attributes {stable_mosaic.version = 11 : i64} {
  func.func @_encoder_kernel(%arg0: i32, %arg1: memref<256x64xbf16, #tpu.memory_space<vmem>>, %arg2: memref<352x128xbf16, #tpu.memory_space<vmem>>, %arg3: memref<40x128xf32, #tpu.memory_space<vmem>>, %arg4: memref<32x8xf32, #tpu.memory_space<vmem>>, %arg5: memref<2x128xf32, #tpu.memory_space<vmem>>) attributes {dimension_semantics = [#tpu.dimension_semantics<arbitrary>], iteration_bounds = array<i64: 1>, scalar_prefetch = 0 : i64, scratch_operands = 0 : i64, tpu.core_type = #tpu.core_type<tc>, window_params = [{pipeline_mode = #tpu.pipeline_mode<synchronous>, transform_indices = @transform_0, window_bounds = array<i64: 256, 64>}, {pipeline_mode = #tpu.pipeline_mode<synchronous>, transform_indices = @transform_1, window_bounds = array<i64: 352, 128>}, {pipeline_mode = #tpu.pipeline_mode<synchronous>, transform_indices = @transform_2, window_bounds = array<i64: 40, 128>}, {pipeline_mode = #tpu.pipeline_mode<synchronous>, transform_indices = @transform_3, window_bounds = array<i64: 32, 8>}, {pipeline_mode = #tpu.pipeline_mode<synchronous>, transform_indices = @transform_4, window_bounds = array<i64: 2, 128>}]} {
    %c0 = arith.constant 0 : index
    %c0_0 = arith.constant 0 : index
    %0 = vector.load %arg2[%c0, %c0_0] : memref<352x128xbf16, #tpu.memory_space<vmem>>, vector<64x128xbf16>
    %c64 = arith.constant 64 : index
    %c0_1 = arith.constant 0 : index
    %1 = vector.load %arg2[%c64, %c0_1] : memref<352x128xbf16, #tpu.memory_space<vmem>>, vector<32x128xbf16>
    %c96 = arith.constant 96 : index
    %c0_2 = arith.constant 0 : index
    %2 = vector.load %arg2[%c96, %c0_2] : memref<352x128xbf16, #tpu.memory_space<vmem>>, vector<128x32xbf16>
    %c224 = arith.constant 224 : index
    %c0_3 = arith.constant 0 : index
    %3 = vector.load %arg2[%c224, %c0_3] : memref<352x128xbf16, #tpu.memory_space<vmem>>, vector<128x32xbf16>
    %c0_4 = arith.constant 0 : index
    %c0_5 = arith.constant 0 : index
    %4 = vector.load %arg3[%c0_4, %c0_5] : memref<40x128xf32, #tpu.memory_space<vmem>>, vector<8x128xf32>
    %c8 = arith.constant 8 : index
    %c0_6 = arith.constant 0 : index
    %5 = vector.load %arg3[%c8, %c0_6] : memref<40x128xf32, #tpu.memory_space<vmem>>, vector<16x128xf32>
    %c24 = arith.constant 24 : index
    %c0_7 = arith.constant 0 : index
    %6 = vector.load %arg3[%c24, %c0_7] : memref<40x128xf32, #tpu.memory_space<vmem>>, vector<4x32xf32>
    %c32 = arith.constant 32 : index
    %c0_8 = arith.constant 0 : index
    %7 = vector.load %arg3[%c32, %c0_8] : memref<40x128xf32, #tpu.memory_space<vmem>>, vector<4x32xf32>
    %c0_9 = arith.constant 0 : index
    %c0_10 = arith.constant 0 : index
    %8 = vector.load %arg1[%c0_9, %c0_10] : memref<256x64xbf16, #tpu.memory_space<vmem>>, vector<256x64xbf16>
    %cst = arith.constant dense<0.000000e+00> : vector<256x128xf32>
    %9 = tpu.matmul %8, %0, %cst {dimension_numbers = #tpu.dot_dimension_numbers<[1], [0], [0], [1], [0, 0, 1, 1], [], []>} : vector<256x64xbf16>, vector<64x128xbf16>, vector<256x128xf32> -> vector<256x128xf32>
    %10 = vector.shape_cast %9 : vector<256x128xf32> to vector<32x8x128xf32>
    %11 = vector.shape_cast %4 : vector<8x128xf32> to vector<1x8x128xf32>
    %12 = vector.broadcast %11 : vector<1x8x128xf32> to vector<32x8x128xf32>
    %13 = arith.addf %10, %12 : vector<32x8x128xf32>
    %14 = vector.extract_strided_slice %6 {offsets = [0, 0], sizes = [1, 32], strides = [1, 1]} : vector<4x32xf32> to vector<1x32xf32>
    %15 = vector.extract_strided_slice %6 {offsets = [1, 0], sizes = [1, 32], strides = [1, 1]} : vector<4x32xf32> to vector<1x32xf32>
    %16 = vector.extract_strided_slice %6 {offsets = [2, 0], sizes = [1, 32], strides = [1, 1]} : vector<4x32xf32> to vector<1x32xf32>
    %17 = vector.extract_strided_slice %6 {offsets = [3, 0], sizes = [1, 32], strides = [1, 1]} : vector<4x32xf32> to vector<1x32xf32>
    %18 = vector.extract_strided_slice %13 {offsets = [0, 0, 0], sizes = [32, 8, 4], strides = [1, 1, 1]} : vector<32x8x128xf32> to vector<32x8x4xf32>
    %cst_11 = arith.constant dense<0xFF800000> : vector<32x4xf32>
    %19 = vector.multi_reduction <maximumf>, %18, %cst_11 [1] : vector<32x8x4xf32> to vector<32x4xf32>
    %20 = vector.shape_cast %19 : vector<32x4xf32> to vector<32x1x4xf32>
    %21 = vector.broadcast %20 : vector<32x1x4xf32> to vector<32x8x4xf32>
    %22 = arith.subf %18, %21 : vector<32x8x4xf32>
    %23 = math.exp %22 : vector<32x8x4xf32>
    %cst_12 = arith.constant dense<0.000000e+00> : vector<32x4xf32>
    %24 = vector.multi_reduction <add>, %23, %cst_12 [1] : vector<32x8x4xf32> to vector<32x4xf32>
    %25 = vector.shape_cast %24 : vector<32x4xf32> to vector<32x1x4xf32>
    %cst_13 = arith.constant 2.500000e-01 : f32
    %26 = vector.broadcast %cst_13 : f32 to vector<32x1x4xf32>
    %27 = arith.divf %26, %25 : vector<32x1x4xf32>
    %28 = vector.broadcast %27 : vector<32x1x4xf32> to vector<32x8x4xf32>
    %29 = arith.mulf %23, %28 : vector<32x8x4xf32>
    %cst_14 = arith.constant dense<0.000000e+00> : vector<32x8xf32>
    %30 = vector.multi_reduction <add>, %29, %cst_14 [2] : vector<32x8x4xf32> to vector<32x8xf32>
    %31 = vector.shape_cast %30 : vector<32x8xf32> to vector<32x8x1xf32>
    %32 = vector.broadcast %31 : vector<32x8x1xf32> to vector<32x8x128xf32>
    %33 = arith.mulf %32, %13 : vector<32x8x128xf32>
    %cst_15 = arith.constant dense<0.000000e+00> : vector<32x128xf32>
    %34 = vector.multi_reduction <add>, %33, %cst_15 [1] : vector<32x8x128xf32> to vector<32x128xf32>
    %35 = arith.truncf %34 : vector<32x128xf32> to vector<32x128xbf16>
    %cst_16 = arith.constant dense<0.000000e+00> : vector<32x32xf32>
    %36 = tpu.matmul %35, %2, %cst_16 {dimension_numbers = #tpu.dot_dimension_numbers<[1], [0], [0], [1], [0, 0, 1, 1], [], []>} : vector<32x128xbf16>, vector<128x32xbf16>, vector<32x32xf32> -> vector<32x32xf32>
    %37 = vector.broadcast %15 : vector<1x32xf32> to vector<32x32xf32>
    %38 = arith.addf %36, %37 : vector<32x32xf32>
    %39 = vector.broadcast %14 : vector<1x32xf32> to vector<32x32xf32>
    %40 = arith.addf %39, %38 : vector<32x32xf32>
    %cst_17 = arith.constant dense<0.000000e+00> : vector<32xf32>
    %41 = vector.multi_reduction <add>, %40, %cst_17 [1] : vector<32x32xf32> to vector<32xf32>
    %42 = vector.shape_cast %41 : vector<32xf32> to vector<32x1xf32>
    %cst_18 = arith.constant 3.200000e+01 : f32
    %43 = vector.broadcast %cst_18 : f32 to vector<32x1xf32>
    %44 = arith.divf %42, %43 : vector<32x1xf32>
    %45 = vector.broadcast %44 : vector<32x1xf32> to vector<32x32xf32>
    %46 = arith.subf %40, %45 : vector<32x32xf32>
    %47 = arith.mulf %46, %46 : vector<32x32xf32>
    %cst_19 = arith.constant dense<0.000000e+00> : vector<32xf32>
    %48 = vector.multi_reduction <add>, %47, %cst_19 [1] : vector<32x32xf32> to vector<32xf32>
    %49 = vector.shape_cast %48 : vector<32xf32> to vector<32x1xf32>
    %cst_20 = arith.constant 3.200000e+01 : f32
    %50 = vector.broadcast %cst_20 : f32 to vector<32x1xf32>
    %51 = arith.divf %49, %50 : vector<32x1xf32>
    %52 = vector.broadcast %44 : vector<32x1xf32> to vector<32x32xf32>
    %53 = arith.subf %40, %52 : vector<32x32xf32>
    %cst_21 = arith.constant 9.99999974E-6 : f32
    %54 = vector.broadcast %cst_21 : f32 to vector<32x1xf32>
    %55 = arith.addf %51, %54 : vector<32x1xf32>
    %56 = math.rsqrt %55 : vector<32x1xf32>
    %57 = vector.broadcast %56 : vector<32x1xf32> to vector<32x32xf32>
    %58 = arith.mulf %53, %57 : vector<32x32xf32>
    %59 = vector.broadcast %16 : vector<1x32xf32> to vector<32x32xf32>
    %60 = arith.mulf %58, %59 : vector<32x32xf32>
    %61 = vector.broadcast %17 : vector<1x32xf32> to vector<32x32xf32>
    %62 = arith.addf %60, %61 : vector<32x32xf32>
    %c0_22 = arith.constant 0 : index
    %c0_23 = arith.constant 0 : index
    %63 = vector.load %arg4[%c0_22, %c0_23] : memref<32x8xf32, #tpu.memory_space<vmem>>, vector<32x8xf32>
    tpu.vector_store %arg4[%c0_22, %c0_23], %30 {strides = array<i32>} : memref<32x8xf32, #tpu.memory_space<vmem>>, vector<32x8xf32>,
    %64 = arith.truncf %62 : vector<32x32xf32> to vector<32x32xbf16>
    %cst_24 = arith.constant dense<0.000000e+00> : vector<32x128xf32>
    %65 = tpu.matmul %64, %1, %cst_24 {dimension_numbers = #tpu.dot_dimension_numbers<[1], [0], [0], [1], [0, 0, 1, 1], [], []>} : vector<32x32xbf16>, vector<32x128xbf16>, vector<32x128xf32> -> vector<32x128xf32>
    %66 = vector.shape_cast %65 : vector<32x128xf32> to vector<2x16x128xf32>
    %67 = vector.shape_cast %5 : vector<16x128xf32> to vector<1x16x128xf32>
    %68 = vector.broadcast %67 : vector<1x16x128xf32> to vector<2x16x128xf32>
    %69 = arith.addf %66, %68 : vector<2x16x128xf32>
    %70 = vector.extract_strided_slice %7 {offsets = [0, 0], sizes = [1, 32], strides = [1, 1]} : vector<4x32xf32> to vector<1x32xf32>
    %71 = vector.extract_strided_slice %7 {offsets = [1, 0], sizes = [1, 32], strides = [1, 1]} : vector<4x32xf32> to vector<1x32xf32>
    %72 = vector.extract_strided_slice %7 {offsets = [2, 0], sizes = [1, 32], strides = [1, 1]} : vector<4x32xf32> to vector<1x32xf32>
    %73 = vector.extract_strided_slice %7 {offsets = [3, 0], sizes = [1, 32], strides = [1, 1]} : vector<4x32xf32> to vector<1x32xf32>
    %74 = vector.extract_strided_slice %69 {offsets = [0, 0, 0], sizes = [2, 16, 4], strides = [1, 1, 1]} : vector<2x16x128xf32> to vector<2x16x4xf32>
    %cst_25 = arith.constant dense<0xFF800000> : vector<2x4xf32>
    %75 = vector.multi_reduction <maximumf>, %74, %cst_25 [1] : vector<2x16x4xf32> to vector<2x4xf32>
    %76 = vector.shape_cast %75 : vector<2x4xf32> to vector<2x1x4xf32>
    %77 = vector.broadcast %76 : vector<2x1x4xf32> to vector<2x16x4xf32>
    %78 = arith.subf %74, %77 : vector<2x16x4xf32>
    %79 = math.exp %78 : vector<2x16x4xf32>
    %cst_26 = arith.constant dense<0.000000e+00> : vector<2x4xf32>
    %80 = vector.multi_reduction <add>, %79, %cst_26 [1] : vector<2x16x4xf32> to vector<2x4xf32>
    %81 = vector.shape_cast %80 : vector<2x4xf32> to vector<2x1x4xf32>
    %cst_27 = arith.constant 2.500000e-01 : f32
    %82 = vector.broadcast %cst_27 : f32 to vector<2x1x4xf32>
    %83 = arith.divf %82, %81 : vector<2x1x4xf32>
    %84 = vector.broadcast %83 : vector<2x1x4xf32> to vector<2x16x4xf32>
    %85 = arith.mulf %79, %84 : vector<2x16x4xf32>
    %cst_28 = arith.constant dense<0.000000e+00> : vector<2x16xf32>
    %86 = vector.multi_reduction <add>, %85, %cst_28 [2] : vector<2x16x4xf32> to vector<2x16xf32>
    %87 = vector.shape_cast %86 : vector<2x16xf32> to vector<2x16x1xf32>
    %88 = vector.broadcast %87 : vector<2x16x1xf32> to vector<2x16x128xf32>
    %89 = arith.mulf %88, %69 : vector<2x16x128xf32>
    %cst_29 = arith.constant dense<0.000000e+00> : vector<2x128xf32>
    %90 = vector.multi_reduction <add>, %89, %cst_29 [1] : vector<2x16x128xf32> to vector<2x128xf32>
    %91 = arith.truncf %90 : vector<2x128xf32> to vector<2x128xbf16>
    %cst_30 = arith.constant dense<0.000000e+00> : vector<2x32xf32>
    %92 = tpu.matmul %91, %3, %cst_30 {dimension_numbers = #tpu.dot_dimension_numbers<[1], [0], [0], [1], [0, 0, 1, 1], [], []>} : vector<2x128xbf16>, vector<128x32xbf16>, vector<2x32xf32> -> vector<2x32xf32>
    %93 = vector.broadcast %71 : vector<1x32xf32> to vector<2x32xf32>
    %94 = arith.addf %92, %93 : vector<2x32xf32>
    %95 = vector.broadcast %70 : vector<1x32xf32> to vector<2x32xf32>
    %96 = arith.addf %95, %94 : vector<2x32xf32>
    %cst_31 = arith.constant dense<0.000000e+00> : vector<2xf32>
    %97 = vector.multi_reduction <add>, %96, %cst_31 [1] : vector<2x32xf32> to vector<2xf32>
    %98 = vector.shape_cast %97 : vector<2xf32> to vector<2x1xf32>
    %cst_32 = arith.constant 3.200000e+01 : f32
    %99 = vector.broadcast %cst_32 : f32 to vector<2x1xf32>
    %100 = arith.divf %98, %99 : vector<2x1xf32>
    %101 = vector.broadcast %100 : vector<2x1xf32> to vector<2x32xf32>
    %102 = arith.subf %96, %101 : vector<2x32xf32>
    %103 = arith.mulf %102, %102 : vector<2x32xf32>
    %cst_33 = arith.constant dense<0.000000e+00> : vector<2xf32>
    %104 = vector.multi_reduction <add>, %103, %cst_33 [1] : vector<2x32xf32> to vector<2xf32>
    %105 = vector.shape_cast %104 : vector<2xf32> to vector<2x1xf32>
    %cst_34 = arith.constant 3.200000e+01 : f32
    %106 = vector.broadcast %cst_34 : f32 to vector<2x1xf32>
    %107 = arith.divf %105, %106 : vector<2x1xf32>
    %108 = vector.broadcast %100 : vector<2x1xf32> to vector<2x32xf32>
    %109 = arith.subf %96, %108 : vector<2x32xf32>
    %cst_35 = arith.constant 9.99999974E-6 : f32
    %110 = vector.broadcast %cst_35 : f32 to vector<2x1xf32>
    %111 = arith.addf %107, %110 : vector<2x1xf32>
    %112 = math.rsqrt %111 : vector<2x1xf32>
    %113 = vector.broadcast %112 : vector<2x1xf32> to vector<2x32xf32>
    %114 = arith.mulf %109, %113 : vector<2x32xf32>
    %115 = vector.broadcast %72 : vector<1x32xf32> to vector<2x32xf32>
    %116 = arith.mulf %114, %115 : vector<2x32xf32>
    %117 = vector.broadcast %73 : vector<1x32xf32> to vector<2x32xf32>
    %118 = arith.addf %116, %117 : vector<2x32xf32>
    %cst_36 = arith.constant 0.000000e+00 : f32
    %119 = vector.broadcast %cst_36 : f32 to vector<2x128xf32>
    %c0_37 = arith.constant 0 : index
    %c0_38 = arith.constant 0 : index
    %120 = vector.load %arg5[%c0_37, %c0_38] : memref<2x128xf32, #tpu.memory_space<vmem>>, vector<2x128xf32>
    tpu.vector_store %arg5[%c0_37, %c0_38], %119 {strides = array<i32>} : memref<2x128xf32, #tpu.memory_space<vmem>>, vector<2x128xf32>,
    %c0_39 = arith.constant 0 : index
    %c0_40 = arith.constant 0 : index
    %121 = vector.load %arg5[%c0_39, %c0_40] : memref<2x128xf32, #tpu.memory_space<vmem>>, vector<2x32xf32>
    tpu.vector_store %arg5[%c0_39, %c0_40], %118 {strides = array<i32>} : memref<2x128xf32, #tpu.memory_space<vmem>>, vector<2x32xf32>,
    %c0_41 = arith.constant 0 : index
    %c32_42 = arith.constant 32 : index
    %122 = vector.load %arg5[%c0_41, %c32_42] : memref<2x128xf32, #tpu.memory_space<vmem>>, vector<2x16xf32>
    tpu.vector_store %arg5[%c0_41, %c32_42], %86 {strides = array<i32>} : memref<2x128xf32, #tpu.memory_space<vmem>>, vector<2x16xf32>,
    return
  }
  func.func @transform_0(%arg0: i32) -> (i32, i32) {
    %c0_i32 = arith.constant 0 : i32
    %c0_i32_0 = arith.constant 0 : i32
    %c0_i32_1 = arith.constant 0 : i32
    return %c0_i32, %c0_i32_0 : i32, i32
  }
  func.func @transform_1(%arg0: i32) -> (i32, i32) {
    %c0_i32 = arith.constant 0 : i32
    %c0_i32_0 = arith.constant 0 : i32
    %c0_i32_1 = arith.constant 0 : i32
    return %c0_i32, %c0_i32_0 : i32, i32
  }
  func.func @transform_2(%arg0: i32) -> (i32, i32) {
    %c0_i32 = arith.constant 0 : i32
    %c0_i32_0 = arith.constant 0 : i32
    %c0_i32_1 = arith.constant 0 : i32
    return %c0_i32, %c0_i32_0 : i32, i32
  }
  func.func @transform_3(%arg0: i32) -> (i32, i32) {
    %c0_i32 = arith.constant 0 : i32
    %c0_i32_0 = arith.constant 0 : i32
    %c0_i32_1 = arith.constant 0 : i32
    return %c0_i32, %c0_i32_0 : i32, i32
  }
  func.func @transform_4(%arg0: i32) -> (i32, i32) {
    %c0_i32 = arith.constant 0 : i32
    %c0_i32_0 = arith.constant 0 : i32
    %c0_i32_1 = arith.constant 0 : i32
    return %c0_i32, %c0_i32_0 : i32, i32
  }
}

</mosaic_0001>

<bundles_post_ra>
// kernel: encoder_forward.1
= control target key start
LH: loop header
LB: loop body
LE: loop exit
PB: predicated region body
PF: predicated region fallthrough
CT: control target
= control target key end

     0   :  { %vm202_vm0 = vcmask 523264   ;;  %vm444_vm1 = vcmask 31744   ;;  %vm1505_vm2 = vcmask 1041409   ;;  %vm1507_vm3 = vcmask 1042434   ;;  %s3623_s1 = inlined_call_operand.vmem [shape: bf16[352,128], index: 1, kind: input, shape index: {}]   ;;  %s3624_s0 = inlined_call_operand.vmem [shape: bf16[256,64], index: 0, kind: input, shape index: {}]   ;;  %s3625_s2 = inlined_call_operand.vmem [shape: f32[40,128], index: 2, kind: input, shape index: {}]   ;;  %s3626_s3 = inlined_call_operand.vmem [shape: f32[32,8], index: 3, kind: output, shape index: {0}]   ;;  %s3627_s4 = inlined_call_operand.vmem [shape: f32[2,128], index: 4, kind: output, shape index: {1}]  }
   0x1   :  { %v2435_v0 = vld [vmem:[%s3623_s1] sm:$0xff]   ;;  %v2436_v1 = vld [vmem:[%s3623_s1 + $0x8] sm:$0xff]   ;;  %v2437_v2 = vld [vmem:[%s3623_s1 + $0x10] sm:$0xff]   ;;  %vm1509_vm4 = vcmask 1043459   ;;  %vm1511_vm5 = vcmask 1044484   ;;  %vm1513_vm6 = vcmask 1045509  }
   0x2   :  { %2345 = vmatprep.subr.bf16.mxu0 %v2435_v0  ;;  %v2439_v3 = vld [vmem:[%s3624_s0] sm:$0xff]   ;;  %v2438_v4 = vld [vmem:[%s3623_s1 + $0x18] sm:$0xff]   ;;  %v2440_v5 = vld [vmem:[%s3624_s0 + $0x8] sm:$0xff]   ;;  %vm1515_vm7 = vcmask 1046534   ;;  %vm1517_vm8 = vcmask 1047559   ;;  %vm1913_vm9 = vcmask 64512  }
   0x3   :  { %2346 = vmatpush3.bf16.msra.mxu0 %v2435_v0  ;;  %2353 = vmatprep.mubr.msk.bf16.mxu0 %vm202_vm0, %v2439_v3  ;;  %v2441_v6 = vld [vmem:[%s3624_s0 + $0x10] sm:$0xff]   ;;  %v2442_v7 = vld [vmem:[%s3624_s0 + $0x18] sm:$0xff]   ;;  %v2443_v8 = vld [vmem:[%s3624_s0 + $0x20] sm:$0xff]   ;;  %vm1649_vm10 = vcmask 261120   ;;  %vm2624_vm11 = vmmov 0   ;;  %vm2223_vm12 = vcmask 392512  }
   0x4   :  { %2347 = vmatprep.subr.bf16.mxu0 %v2436_v1  ;;  %v2444_v9 = vld [vmem:[%s3624_s0 + $0x28] sm:$0xff]   ;;  %v2445_v10 = vld [vmem:[%s3624_s0 + $0x30] sm:$0xff]   ;;  %v2446_v11 = vld [vmem:[%s3624_s0 + $0x38] sm:$0xff]   ;;  %vm2183_vm13 = vcmask 254976   ;;  %vm2236_vm14 = vcmask 386304  }
   0x5   :  { %v2447_v12 = vld [vmem:[%s3624_s0 + $0x40] sm:$0xff]   ;;  %v2448_v13 = vld [vmem:[%s3624_s0 + $0x48] sm:$0xff]   ;;  %v2449_v14 = vld [vmem:[%s3624_s0 + $0x50] sm:$0xff]  }
   0x6   :  { %v2450_v15 = vld [vmem:[%s3624_s0 + $0x58] sm:$0xff]   ;;  %v2451_v16 = vld [vmem:[%s3624_s0 + $0x60] sm:$0xff]   ;;  %v2452_v17 = vld [vmem:[%s3624_s0 + $0x68] sm:$0xff]  }
   0x7   :  { %2348 = vmatpush3.bf16.msra.mxu0 %v2436_v1  ;;  %v2453_v18 = vld [vmem:[%s3624_s0 + $0x70] sm:$0xff]   ;;  %v2454_v19 = vld [vmem:[%s3624_s0 + $0x78] sm:$0xff]   ;;  %v2729_v20 = vld [vmem:[%s3625_s2] sm:$0xff] }
   0x8   :  { %2349 = vmatprep.subr.bf16.mxu0 %v2437_v2 }
   0xb   :  { %2350 = vmatpush3.bf16.msra.mxu0 %v2437_v2 }
   0xc   :  { %2351 = vmatprep.subr.bf16.mxu0 %v2438_v4 }
   0xf   :  { %2352 = vmatpush3.bf16.msra.mxu0 %v2438_v4 }
  0x12   :  { %2354 = vmatmul.mubr.msk.bf16.vlgmr.msra.gmra.mrb[0].mxu0 %vm202_vm0, %v2440_v5 }
  0x13   :  { %2357 = vmatprep.mubr.msk.bf16.mxu0 %vm202_vm0, %v2441_v6 }
  0x1a   :  { %2358 = vmatmul.mubr.msk.bf16.gmra.mrb[4].mxu0 %vm202_vm0, %v2442_v7 }
  0x1b   :  { %2361 = vmatprep.mubr.msk.bf16.mxu0 %vm202_vm0, %v2443_v8 }
  0x22   :  { %2362 = vmatmul.mubr.msk.bf16.gmra.mrb[8].mxu0 %vm202_vm0, %v2444_v9 }
  0x23   :  { %2365 = vmatprep.mubr.msk.bf16.mxu0 %vm202_vm0, %v2445_v10 }
  0x2a   :  { %2366 = vmatmul.mubr.msk.bf16.gmra.mrb[12].mxu0 %vm202_vm0, %v2446_v11 }
  0x2b   :  { %2369 = vmatprep.mubr.msk.bf16.mxu0 %vm202_vm0, %v2447_v12 }
  0x32   :  { %2370 = vmatmul.mubr.msk.bf16.gmra.mrb[16].mxu0 %vm202_vm0, %v2448_v13 }
  0x33   :  { %2373 = vmatprep.mubr.msk.bf16.mxu0 %vm202_vm0, %v2449_v14 }
  0x3a   :  { %2374 = vmatmul.mubr.msk.bf16.gmra.mrb[20].mxu0 %vm202_vm0, %v2450_v15 }
  0x3b   :  { %2377 = vmatprep.mubr.msk.bf16.mxu0 %vm202_vm0, %v2451_v16 }
  0x42   :  { %2378 = vmatmul.mubr.msk.bf16.gmra.mrb[24].mxu0 %vm202_vm0, %v2452_v17 }
  0x43   :  { %2381 = vmatprep.mubr.msk.bf16.mxu0 %vm202_vm0, %v2453_v18 }
  0x4a   :  { %2382 = vmatmul.mubr.msk.bf16.gmra.mrb[28].mxu0 %vm202_vm0, %v2454_v19 }
  0xe5   :  { %v2355_v21 = vpop.f32.mrb[0].mxu0 }
  0xe6   :  { %v2732_v22 = vadd.f32 %v2355_v21, %v2729_v20  ;;  %v285_v23 = vpop.f32.mrb[1].mxu0 }
  0xe7   :  { %v2735_v24 = vadd.f32 %v285_v23, %v2729_v20  ;;  %v2356_v25 = vpop.f32.mrb[2].mxu0 }
  0xe8   :  { %v459_v26 = vsel %vm444_vm1, %v2732_v22, -inf  ;;  %v2740_v27 = vadd.f32 %v2356_v25, %v2729_v20  ;;  %v288_v28 = vpop.f32.mrb[3].mxu0 }
  0xe9   :  { %v460_v29 = vrot.slane %v459_v26, 4  ;;  %v445_v30 = vsel %vm444_vm1, %v2735_v24, -inf  ;;  %v2745_v31 = vadd.f32 %v288_v28, %v2729_v20 }
  0xea   :  { %v446_v32 = vrot.slane %v445_v30, 4  ;;  %v466_v33 = vsel %vm444_vm1, %v2740_v27, -inf }
  0xeb   :  { %v461_v34 = vmax.f32 %v459_v26, %v460_v29  ;;  %v467_v35 = vrot.slane %v466_v33, 4  ;;  %v452_v36 = vsel %vm444_vm1, %v2745_v31, -inf }
  0xec   :  { %v447_v37 = vmax.f32 %v445_v30, %v446_v32  ;;  %v453_v38 = vrot.slane %v452_v36, 4 }
  0xed   :  { %v462_v39 = vrot.slane %v461_v34, 2  ;;  %v468_v40 = vmax.f32 %v466_v33, %v467_v35  ;;  %v2359_v41 = vpop.f32.mrb[4].mxu0 }
  0xee   :  { %v448_v42 = vrot.slane %v447_v37, 2  ;;  %v454_v43 = vmax.f32 %v452_v36, %v453_v38  ;;  %v2752_v44 = vadd.f32 %v2359_v41, %v2729_v20  ;;  %v301_v45 = vpop.f32.mrb[5].mxu0 }
  0xef   :  { %v463_v46 = vmax.f32 %v461_v34, %v462_v39  ;;  %v469_v47 = vrot.slane %v468_v40, 2  ;;  %v2755_v48 = vadd.f32 %v301_v45, %v2729_v20  ;;  %v2360_v49 = vpop.f32.mrb[6].mxu0 }
  0xf0   :  { %v449_v50 = vmax.f32 %v447_v37, %v448_v42  ;;  %v455_v51 = vrot.slane %v454_v43, 2  ;;  %v487_v52 = vsel %vm444_vm1, %v2752_v44, -inf  ;;  %v2760_v53 = vadd.f32 %v2360_v49, %v2729_v20  ;;  %v304_v54 = vpop.f32.mrb[7].mxu0 }
  0xf1   :  { %3654 = vst [vmem:[#allocation2_spill] sm:$0xff] %v2755_v48  ;;  %v464_v55 = vrot.slane %v463_v46, 1  ;;  %v470_v56 = vmax.f32 %v468_v40, %v469_v47  ;;  %v488_v57 = vrot.slane %v487_v52, 4  ;;  %v473_v58 = vsel %vm444_vm1, %v2755_v48, -inf }
  0xf2   :  { %3655 = vst [vmem:[#allocation3_spill] sm:$0xff] %v2760_v53  ;;  %v450_v59 = vrot.slane %v449_v50, 1  ;;  %v456_v60 = vmax.f32 %v454_v43, %v455_v51  ;;  %v474_v61 = vrot.slane %v473_v58, 4  ;;  %v494_v62 = vsel %vm444_vm1, %v2760_v53, -inf }
  0xf3   :  { %v465_v63 = vmax.f32 %v463_v46, %v464_v55  ;;  %v471_v0 = vrot.slane %v470_v56, 1  ;;  %v489_v1 = vmax.f32 %v487_v52, %v488_v57  ;;  %v495_v2 = vrot.slane %v494_v62, 4 }
  0xf4   :  { %v451_v3 = vmax.f32 %v449_v50, %v450_v59  ;;  %v457_v4 = vrot.slane %v456_v60, 1  ;;  %v475_v5 = vmax.f32 %v473_v58, %v474_v61  ;;  %v2767_v6 = vadd.f32 %v304_v54, %v2729_v20 }
  0xf5   :  { %v671_v7 = vsub.f32 %v2732_v22, %v465_v63  ;;  %v472_v8 = vmax.f32 %v470_v56, %v471_v0  ;;  %v490_v9 = vrot.slane %v489_v1, 2  ;;  %v496_v10 = vmax.f32 %v494_v62, %v495_v2  ;;  %v2363_v11 = vpop.f32.mrb[8].mxu0 }
  0xf6   :  { %3656 = vst [vmem:[#allocation4_spill] sm:$0xff] %v2767_v6  ;;  %v669_v12 = vsub.f32 %v2735_v24, %v451_v3  ;;  %v458_v13 = vmax.f32 %v456_v60, %v457_v4  ;;  %v476_v14 = vrot.slane %v475_v5, 2  ;;  %v480_v15 = vsel %vm444_vm1, %v2767_v6, -inf  ;;  %v317_v16 = vpop.f32.mrb[9].mxu0 }
  0xf7   :  { %v705_v17 = vmul.f32 1.442695, %v671_v7  ;;  %v672_v18 = vsub.f32 %v2740_v27, %v472_v8  ;;  %v491_v19 = vmax.f32 %v489_v1, %v490_v9  ;;  %v497_v21 = vrot.slane %v496_v10, 2  ;;  %v2364_v23 = vpop.f32.mrb[10].mxu0 }
  0xf8   :  { %v701_v25 = vmul.f32 1.442695, %v669_v12  ;;  %v670_v26 = vsub.f32 %v2745_v31, %v458_v13  ;;  %v477_v28 = vmax.f32 %v475_v5, %v476_v14  ;;  %v481_v29 = vrot.slane %v480_v15, 4  ;;  %v320_v30 = vpop.f32.mrb[11].mxu0 }
  0xf9   :  { %2473 = vpow2.f32 %v705_v17  ;;  %v707_v32 = vmul.f32 1.442695, %v672_v18  ;;  %v492_v33 = vrot.slane %v491_v19, 1  ;;  %v498_v34 = vmax.f32 %v496_v10, %v497_v21 }
  0xfa   :  { %2475 = vpow2.f32 %v701_v25  ;;  %v703_v35 = vmul.f32 1.442695, %v670_v26  ;;  %v478_v36 = vrot.slane %v477_v28, 1  ;;  %v482_v37 = vmax.f32 %v480_v15, %v481_v29 }
  0xfb   :  { %2477 = vpow2.f32 %v707_v32  ;;  %v493_v38 = vmax.f32 %v491_v19, %v492_v33  ;;  %v499_v39 = vrot.slane %v498_v34, 1  ;;  %v2776_v40 = vadd.f32 %v2363_v11, %v2729_v20 }
  0xfc   :  { %2479 = vpow2.f32 %v703_v35  ;;  %v479_v41 = vmax.f32 %v477_v28, %v478_v36  ;;  %v483_v42 = vrot.slane %v482_v37, 2  ;;  %v2779_v43 = vadd.f32 %v317_v16, %v2729_v20 }
  0xfd   :  { %v675_v45 = vsub.f32 %v2752_v44, %v493_v38  ;;  %v500_v46 = vmax.f32 %v498_v34, %v499_v39  ;;  %v515_v47 = vsel %vm444_vm1, %v2776_v40, -inf  ;;  %v2785_v49 = vadd.f32 %v2364_v23, %v2729_v20  ;;  %v2367_v50 = vpop.f32.mrb[12].mxu0 }
  0xfe   :  { %3657 = vst [vmem:[#allocation5_spill] sm:$0xff] %v2779_v43  ;;  %v673_v51 = vsub.f32 %v2755_v48, %v479_v41  ;;  %v484_v52 = vmax.f32 %v482_v37, %v483_v42  ;;  %v516_v54 = vrot.slane %v515_v47, 4  ;;  %v501_v55 = vsel %vm444_vm1, %v2779_v43, -inf  ;;  %v333_v56 = vpop.f32.mrb[13].mxu0 }
  0xff   :  { %3658 = vst [vmem:[#allocation6_spill] sm:$0xff] %v2785_v49  ;;  %v713_v57 = vmul.f32 1.442695, %v675_v45  ;;  %v676_v58 = vsub.f32 %v2760_v53, %v500_v46  ;;  %v502_v59 = vrot.slane %v501_v55, 4  ;;  %v522_v60 = vsel %vm444_vm1, %v2785_v49, -inf  ;;  %v2368_v61 = vpop.f32.mrb[14].mxu0 }
 0x100   :  { %v709_v62 = vmul.f32 1.442695, %v673_v51  ;;  %v485_v63 = vrot.slane %v484_v52, 1  ;;  %v517_v0 = vmax.f32 %v515_v47, %v516_v54  ;;  %v523_v1 = vrot.slane %v522_v60, 4  ;;  %v336_v2 = vpop.f32.mrb[15].mxu0 }
 0x101   :  { %2481 = vpow2.f32 %v713_v57  ;;  %v715_v3 = vmul.f32 1.442695, %v676_v58  ;;  %v503_v4 = vmax.f32 %v501_v55, %v502_v59  ;;  %v2794_v5 = vadd.f32 %v320_v30, %v2729_v20 }
 0x102   :  { %2483 = vpow2.f32 %v709_v62  ;;  %v486_v7 = vmax.f32 %v484_v52, %v485_v63  ;;  %v518_v8 = vrot.slane %v517_v0, 2  ;;  %v524_v9 = vmax.f32 %v522_v60, %v523_v1 }
 0x103   :  { %3659 = vst [vmem:[#allocation7_spill] sm:$0xff] %v2794_v5  ;;  %v2796_v10 = vpop.eup %2473  ;;  %2485 = vpow2.f32 %v715_v3  ;;  %v504_v11 = vrot.slane %v503_v4, 2  ;;  %v508_v12 = vsel %vm444_vm1, %v2794_v5, -inf  ;;  %v2801_v13 = vadd.f32 %v2367_v50, %v2729_v20 }
 0x104   :  { %v2803_v14 = vpop.eup %2475  ;;  %v674_v15 = vsub.f32 %v2767_v6, %v486_v7  ;;  %v519_v16 = vmax.f32 %v517_v0, %v518_v8  ;;  %v525_v17 = vrot.slane %v524_v9, 2  ;;  %v509_v18 = vrot.slane %v508_v12, 4 }
 0x105   :  { %3660 = vst [vmem:[#allocation8_spill] sm:$0xff] %v2801_v13  ;;  %v2806_v19 = vpop.eup %2477  ;;  %v505_v21 = vmax.f32 %v503_v4, %v504_v11  ;;  %v543_v23 = vsel %vm444_vm1, %v2801_v13, -inf  ;;  %v2811_v25 = vadd.f32 %v333_v56, %v2729_v20  ;;  %v2814_v26 = vadd.f32 %v2368_v61, %v2729_v20  ;;  %v2371_v28 = vpop.f32.mrb[16].mxu0 }
 0x106   :  { %v2816_v29 = vpop.eup %2479  ;;  %v711_v30 = vmul.f32 1.442695, %v674_v15  ;;  %v520_v32 = vrot.slane %v519_v16, 1  ;;  %v526_v33 = vmax.f32 %v524_v9, %v525_v17  ;;  %v510_v34 = vmax.f32 %v508_v12, %v509_v18  ;;  %v349_v35 = vpop.f32.mrb[17].mxu0 }
 0x107   :  { %3661 = vst [vmem:[#allocation9_spill] sm:$0xff] %v2811_v25  ;;  %3662 = vst [vmem:[#allocation10_spill] sm:$0xff] %v2814_v26  ;;  %v506_v36 = vrot.slane %v505_v21, 1  ;;  %v544_v37 = vrot.slane %v543_v23, 4  ;;  %v529_v38 = vsel %vm444_vm1, %v2811_v25, -inf  ;;  %v550_v39 = vsel %vm444_vm1, %v2814_v26, -inf }
 0x108   :  { %v2372_v41 = vpop.f32.mrb[18].mxu0  ;;  %2487 = vpow2.f32 %v711_v30  ;;  %v521_v42 = vmax.f32 %v519_v16, %v520_v32  ;;  %v527_v45 = vrot.slane %v526_v33, 1  ;;  %v511_v46 = vrot.slane %v510_v34, 2 }
 0x109   :  { %v2822_v47 = vpop.f32.mrb[19].mxu0  ;;  %v507_v50 = vmax.f32 %v505_v21, %v506_v36  ;;  %v545_v51 = vmax.f32 %v543_v23, %v544_v37  ;;  %v530_v52 = vrot.slane %v529_v38, 4  ;;  %v551_v54 = vrot.slane %v550_v39, 4 }
 0x10a   :  { %v679_v55 = vsub.f32 %v2776_v40, %v521_v42  ;;  %v528_v56 = vmax.f32 %v526_v33, %v527_v45  ;;  %v512_v57 = vmax.f32 %v510_v34, %v511_v46  ;;  %v2826_v58 = vadd.f32 %v336_v2, %v2729_v20 }
 0x10b   :  { %v2828_v59 = vpop.eup %2481  ;;  %v677_v60 = vsub.f32 %v2779_v43, %v507_v50  ;;  %v546_v61 = vrot.slane %v545_v51, 2  ;;  %v531_v62 = vmax.f32 %v529_v38, %v530_v52  ;;  %v552_v63 = vmax.f32 %v550_v39, %v551_v54 }
 0x10c   :  { %3663 = vst [vmem:[#allocation11_spill] sm:$0xff] %v2826_v58  ;;  %v2831_v0 = vpop.eup %2483  ;;  %v721_v1 = vmul.f32 1.442695, %v679_v55  ;;  %v680_v3 = vsub.f32 %v2785_v49, %v528_v56  ;;  %v513_v4 = vrot.slane %v512_v57, 1  ;;  %v536_v7 = vsel %vm444_vm1, %v2826_v58, -inf }
 0x10d   :  { %v2836_v8 = vpop.eup %2485  ;;  %v717_v2 = vmul.f32 1.442695, %v677_v60  ;;  %v547_v9 = vmax.f32 %v545_v51, %v546_v61  ;;  %v532_v11 = vrot.slane %v531_v62, 2  ;;  %v553_v12 = vrot.slane %v552_v63, 2  ;;  %v2375_v15 = vpop.f32.mrb[20].mxu0 }
 0x10e   :  { %2489 = vpow2.f32 %v721_v1  ;;  %v723_v16 = vmul.f32 1.442695, %v680_v3  ;;  %v514_v17 = vmax.f32 %v512_v57, %v513_v4  ;;  %v537_v18 = vrot.slane %v536_v7, 4  ;;  %v365_v21 = vpop.f32.mrb[21].mxu0 }
 0x10f   :  { %2491 = vpow2.f32 %v717_v2  ;;  %v548_v23 = vrot.slane %v547_v9, 1  ;;  %v533_v30 = vmax.f32 %v531_v62, %v532_v11  ;;  %v554_v32 = vmax.f32 %v552_v63, %v553_v12  ;;  %v2838_v33 = vpop.f32.mrb[22].mxu0 }
 0x110   :  { %2493 = vpow2.f32 %v723_v16  ;;  %v678_v34 = vsub.f32 %v2794_v5, %v514_v17  ;;  %v538_v36 = vmax.f32 %v536_v7, %v537_v18  ;;  %v2842_v37 = vadd.f32 %v2371_v28, %v2729_v20  ;;  %v2844_v38 = vpop.f32.mrb[23].mxu0 }
 0x111   :  { %v549_v39 = vmax.f32 %v547_v9, %v548_v23  ;;  %v534_v42 = vrot.slane %v533_v30, 1  ;;  %v555_v45 = vrot.slane %v554_v32, 1  ;;  %v2847_v46 = vadd.f32 %v349_v35, %v2729_v20 }
 0x112   :  { %3664 = vst [vmem:[#allocation12_spill] sm:$0xff] %v2842_v37  ;;  %v2849_v50 = vpop.eup %2487  ;;  %v719_v51 = vmul.f32 1.442695, %v678_v34  ;;  %v539_v52 = vrot.slane %v538_v36, 2  ;;  %v571_v54 = vsel %vm444_vm1, %v2842_v37, -inf  ;;  %v2854_v55 = vadd.f32 %v2372_v41, %v2729_v20 }
 0x113   :  { %3665 = vst [vmem:[#allocation13_spill] sm:$0xff] %v2847_v46  ;;  %v683_v28 = vsub.f32 %v2801_v13, %v549_v39  ;;  %v535_v56 = vmax.f32 %v533_v30, %v534_v42  ;;  %v556_v57 = vmax.f32 %v554_v32, %v555_v45  ;;  %v572_v60 = vrot.slane %v571_v54, 4 }
 0x114   :  { %3666 = vst [vmem:[#allocation14_spill] sm:$0xff] %v2854_v55  ;;  %2495 = vpow2.f32 %v719_v51  ;;  %v540_v61 = vmax.f32 %v538_v36, %v539_v52  ;;  %v557_v35 = vsel %vm444_vm1, %v2847_v46, -inf  ;;  %v578_v62 = vsel %vm444_vm1, %v2854_v55, -inf }
 0x115   :  { %v729_v63 = vmul.f32 1.442695, %v683_v28  ;;  %v681_v1 = vsub.f32 %v2811_v25, %v535_v56  ;;  %v684_v3 = vsub.f32 %v2814_v26, %v556_v57  ;;  %v573_v41 = vmax.f32 %v571_v54, %v572_v60  ;;  %v2863_v4 = vpop.f32.mrb[24].mxu0 }
 0x116   :  { %v541_v7 = vrot.slane %v540_v61, 1  ;;  %v558_v2 = vrot.slane %v557_v35, 4  ;;  %v579_v9 = vrot.slane %v578_v62, 4  ;;  %v2867_v11 = vadd.f32 %v2822_v47, %v2729_v20  ;;  %v2869_v12 = vpop.f32.mrb[25].mxu0 }
 0x117   :  { %2497 = vpow2.f32 %v729_v63  ;;  %v725_v16 = vmul.f32 1.442695, %v681_v1  ;;  %v731_v17 = vmul.f32 1.442695, %v684_v3  ;;  %v574_v18 = vrot.slane %v573_v41, 2  ;;  %v2871_v23 = vpop.f32.mrb[26].mxu0 }
 0x118   :  { %3667 = vst [vmem:[#allocation15_spill] sm:$0xff] %v2867_v11  ;;  %v2873_v30 = vpop.eup %2489  ;;  %v542_v32 = vmax.f32 %v540_v61, %v541_v7  ;;  %v559_v34 = vmax.f32 %v557_v35, %v558_v2  ;;  %v580_v36 = vmax.f32 %v578_v62, %v579_v9  ;;  %v564_v39 = vsel %vm444_vm1, %v2867_v11, -inf  ;;  %v2877_v42 = vpop.f32.mrb[27].mxu0 }
 0x119   :  { %v2879_v47 = vpop.eup %2491  ;;  %2499 = vpow2.f32 %v725_v16  ;;  %v575_v45 = vmax.f32 %v573_v41, %v574_v18  ;;  %v565_v51 = vrot.slane %v564_v39, 4  ;;  %v2882_v52 = vadd.f32 %v2375_v15, %v2729_v20 }
 0x11a   :  { %v2884_v54 = vpop.eup %2493  ;;  %2501 = vpow2.f32 %v731_v17  ;;  %v682_v28 = vsub.f32 %v2826_v58, %v542_v32  ;;  %v560_v56 = vrot.slane %v559_v34, 2  ;;  %v581_v57 = vrot.slane %v580_v36, 2 }
 0x11b   :  { %3668 = vst [vmem:[#allocation16_spill] sm:$0xff] %v2882_v52  ;;  %v576_v60 = vrot.slane %v575_v45, 1  ;;  %v566_v61 = vmax.f32 %v564_v39, %v565_v51  ;;  %v599_v35 = vsel %vm444_vm1, %v2882_v52, -inf  ;;  %v2890_v62 = vadd.f32 %v365_v21, %v2729_v20 }
 0x11c   :  { %v727_v63 = vmul.f32 1.442695, %v682_v28  ;;  %v561_v1 = vmax.f32 %v559_v34, %v560_v56  ;;  %v582_v3 = vmax.f32 %v580_v36, %v581_v57  ;;  %v600_v15 = vrot.slane %v599_v35, 4 }
 0x11d   :  { %3669 = vst [vmem:[#allocation17_spill] sm:$0xff] %v2890_v62  ;;  %v577_v41 = vmax.f32 %v575_v45, %v576_v60  ;;  %v567_v7 = vrot.slane %v566_v61, 2  ;;  %v585_v2 = vsel %vm444_vm1, %v2890_v62, -inf  ;;  %v2896_v9 = vadd.f32 %v2838_v33, %v2729_v20  ;;  %v2898_v16 = vpop.f32.mrb[28].mxu0 }
 0x11e   :  { %v2900_v17 = vpop.eup %2495  ;;  %2503 = vpow2.f32 %v727_v63  ;;  %v562_v21 = vrot.slane %v561_v1, 1  ;;  %v583_v18 = vrot.slane %v582_v3, 1  ;;  %v601_v32 = vmax.f32 %v599_v35, %v600_v15  ;;  %v2902_v34 = vpop.f32.mrb[29].mxu0 }
 0x11f   :  { %3670 = vst [vmem:[#allocation18_spill] sm:$0xff] %v2896_v9  ;;  %v687_v36 = vsub.f32 %v2842_v37, %v577_v41  ;;  %v568_v39 = vmax.f32 %v566_v61, %v567_v7  ;;  %v586_v45 = vrot.slane %v585_v2, 4  ;;  %v606_v51 = vsel %vm444_vm1, %v2896_v9, -inf  ;;  %v2907_v28 = vpop.f32.mrb[30].mxu0 }
 0x120   :  { %v563_v33 = vmax.f32 %v561_v1, %v562_v21  ;;  %v584_v56 = vmax.f32 %v582_v3, %v583_v18  ;;  %v602_v57 = vrot.slane %v601_v32, 2  ;;  %v607_v60 = vrot.slane %v606_v51, 4  ;;  %v2909_v58 = vpop.f32.mrb[31].mxu0 }
 0x121   :  { %v2911_v63 = vpop.eup %2497  ;;  %v737_v35 = vmul.f32 1.442695, %v687_v36  ;;  %v569_v15 = vrot.slane %v568_v39, 1  ;;  %v587_v26 = vmax.f32 %v585_v2, %v586_v45  ;;  %v2915_v61 = vadd.f32 %v2844_v38, %v2729_v20 }
 0x122   :  { %v685_v41 = vsub.f32 %v2847_v46, %v563_v33  ;;  %v688_v7 = vsub.f32 %v2854_v55, %v584_v56  ;;  %v603_v25 = vmax.f32 %v601_v32, %v602_v57  ;;  %v608_v1 = vmax.f32 %v606_v51, %v607_v60 }
 0x123   :  { %3671 = vst [vmem:[#allocation19_spill] sm:$0xff] %v2915_v61  ;;  %v2919_v3 = vpop.eup %2499  ;;  %2505 = vpow2.f32 %v737_v35  ;;  %v570_v21 = vmax.f32 %v568_v39, %v569_v15  ;;  %v588_v18 = vrot.slane %v587_v26, 2  ;;  %v592_v36 = vsel %vm444_vm1, %v2915_v61, -inf }
 0x124   :  { %v2923_v37 = vpop.eup %2501  ;;  %v733_v2 = vmul.f32 1.442695, %v685_v41  ;;  %v739_v45 = vmul.f32 1.442695, %v688_v7  ;;  %v604_v38 = vrot.slane %v603_v25, 1  ;;  %v609_v13 = vrot.slane %v608_v1, 2 }
 0x125   :  { %v686_v33 = vsub.f32 %v2867_v11, %v570_v21  ;;  %v589_v46 = vmax.f32 %v587_v26, %v588_v18  ;;  %v593_v56 = vrot.slane %v592_v36, 4  ;;  %v2928_v32 = vadd.f32 %v2863_v4, %v2729_v20 }
 0x126   :  { %2507 = vpow2.f32 %v733_v2  ;;  %v605_v39 = vmax.f32 %v603_v25, %v604_v38  ;;  %v610_v51 = vmax.f32 %v608_v1, %v609_v13  ;;  %v2932_v57 = vadd.f32 %v2869_v12, %v2729_v20 }
 0x127   :  { %3672 = vst [vmem:[#allocation20_spill] sm:$0xff] %v2928_v32  ;;  %2509 = vpow2.f32 %v739_v45  ;;  %v735_v60 = vmul.f32 1.442695, %v686_v33  ;;  %v590_v35 = vrot.slane %v589_v46, 1  ;;  %v594_v15 = vmax.f32 %v592_v36, %v593_v56 }
 0x128   :  { %3673 = vst [vmem:[#allocation21_spill] sm:$0xff] %v2932_v57  ;;  %v2934_v41 = vpop.eup %2503  ;;  %v691_v26 = vsub.f32 %v2882_v52, %v605_v39  ;;  %v611_v7 = vrot.slane %v610_v51, 1  ;;  %v627_v4 = vsel %vm444_vm1, %v2928_v32, -inf  ;;  %v613_v25 = vsel %vm444_vm1, %v2932_v57, -inf }
 0x129   :  { %2511 = vpow2.f32 %v735_v60  ;;  %v591_v13 = vmax.f32 %v589_v46, %v590_v35  ;;  %v595_v1 = vrot.slane %v594_v15, 2  ;;  %v628_v12 = vrot.slane %v627_v4, 4 }
 0x12a   :  { %v745_v21 = vmul.f32 1.442695, %v691_v26  ;;  %v612_v18 = vmax.f32 %v610_v51, %v611_v7  ;;  %v614_v2 = vrot.slane %v613_v25, 4  ;;  %v2943_v36 = vadd.f32 %v2871_v23, %v2729_v20 }
 0x12b   :  { %v689_v45 = vsub.f32 %v2890_v62, %v591_v13  ;;  %v596_v38 = vmax.f32 %v594_v15, %v595_v1  ;;  %v629_v33 = vmax.f32 %v627_v4, %v628_v12  ;;  %v2948_v56 = vadd.f32 %v2877_v42, %v2729_v20 }
 0x12c   :  { %3674 = vst [vmem:[#allocation22_spill] sm:$0xff] %v2943_v36  ;;  %2513 = vpow2.f32 %v745_v21  ;;  %v692_v46 = vsub.f32 %v2896_v9, %v612_v18  ;;  %v615_v39 = vmax.f32 %v613_v25, %v614_v2  ;;  %v634_v51 = vsel %vm444_vm1, %v2943_v36, -inf }
 0x12d   :  { %3675 = vst [vmem:[#allocation23_spill] sm:$0xff] %v2948_v56  ;;  %v2953_v60 = vpop.eup %2505  ;;  %v741_v35 = vmul.f32 1.442695, %v689_v45  ;;  %v597_v23 = vrot.slane %v596_v38, 1  ;;  %v630_v26 = vrot.slane %v629_v33, 2  ;;  %v635_v7 = vrot.slane %v634_v51, 4 }
 0x12e   :  { %v747_v13 = vmul.f32 1.442695, %v692_v46  ;;  %v616_v15 = vrot.slane %v615_v39, 2  ;;  %v620_v4 = vsel %vm444_vm1, %v2948_v56, -inf  ;;  %v2959_v42 = vadd.f32 %v2898_v16, %v2729_v20 }
 0x12f   :  { %2515 = vpow2.f32 %v741_v35  ;;  %v598_v25 = vmax.f32 %v596_v38, %v597_v23  ;;  %v631_v1 = vmax.f32 %v629_v33, %v630_v26  ;;  %v636_v12 = vmax.f32 %v634_v51, %v635_v7 }
 0x130   :  { %3676 = vst [vmem:[#allocation24_spill] sm:$0xff] %v2959_v42  ;;  %v2961_v21 = vpop.eup %2507  ;;  %2517 = vpow2.f32 %v747_v13  ;;  %v617_v18 = vmax.f32 %v615_v39, %v616_v15  ;;  %v621_v2 = vrot.slane %v620_v4, 4  ;;  %v655_v45 = vsel %vm444_vm1, %v2959_v42, -inf }
 0x131   :  { %v2965_v46 = vpop.eup %2509  ;;  %v690_v9 = vsub.f32 %v2915_v61, %v598_v25  ;;  %v632_v52 = vrot.slane %v631_v1, 1  ;;  %v637_v11 = vrot.slane %v636_v12, 2  ;;  %v656_v16 = vrot.slane %v655_v45, 4 }
 0x132   :  { %v618_v62 = vrot.slane %v617_v18, 1  ;;  %v622_v35 = vmax.f32 %v620_v4, %v621_v2  ;;  %v2970_v38 = vadd.f32 %v2902_v34, %v2729_v20  ;;  %v2974_v33 = vadd.f32 %v2907_v28, %v2729_v20 }
 0x133   :  { %v2976_v39 = vpop.eup %2511  ;;  %v743_v51 = vmul.f32 1.442695, %v690_v9  ;;  %v633_v23 = vmax.f32 %v631_v1, %v632_v52  ;;  %v638_v26 = vmax.f32 %v636_v12, %v637_v11  ;;  %v657_v7 = vmax.f32 %v655_v45, %v656_v16 }
 0x134   :  { %3677 = vst [vmem:[#allocation25_spill] sm:$0xff] %v2970_v38  ;;  %3678 = vst [vmem:[#allocation26_spill] sm:$0xff] %v2974_v33  ;;  %v619_v13 = vmax.f32 %v617_v18, %v618_v62  ;;  %v623_v15 = vrot.slane %v622_v35, 2  ;;  %v641_v25 = vsel %vm444_vm1, %v2970_v38, -inf  ;;  %v662_v4 = vsel %vm444_vm1, %v2974_v33, -inf }
 0x135   :  { %2519 = vpow2.f32 %v743_v51  ;;  %v695_v34 = vsub.f32 %v2928_v32, %v633_v23  ;;  %v639_v2 = vrot.slane %v638_v26, 1  ;;  %v658_v28 = vrot.slane %v657_v7, 2 }
 0x136   :  { %v2983_v61 = vpop.eup %2513  ;;  %v693_v9 = vsub.f32 %v2932_v57, %v619_v13  ;;  %v624_v52 = vmax.f32 %v622_v35, %v623_v15  ;;  %v642_v11 = vrot.slane %v641_v25, 4  ;;  %v663_v1 = vrot.slane %v662_v4, 4 }
 0x137   :  { %v753_v62 = vmul.f32 1.442695, %v695_v34  ;;  %v640_v12 = vmax.f32 %v638_v26, %v639_v2  ;;  %v659_v18 = vmax.f32 %v657_v7, %v658_v28  ;;  %v2988_v45 = vadd.f32 %v2909_v58, %v2729_v20 }
 0x138   :  { %v749_v16 = vmul.f32 1.442695, %v693_v9  ;;  %v625_v51 = vrot.slane %v624_v52, 1  ;;  %v643_v55 = vmax.f32 %v641_v25, %v642_v11  ;;  %v664_v23 = vmax.f32 %v662_v4, %v663_v1 }
 0x139   :  { %3679 = vst [vmem:[#allocation27_spill] sm:$0xff] %v2988_v45  ;;  %v2990_v32 = vpop.eup %2515  ;;  %2521 = vpow2.f32 %v753_v62  ;;  %v696_v5 = vsub.f32 %v2943_v36, %v640_v12  ;;  %v660_v13 = vrot.slane %v659_v18, 1  ;;  %v648_v35 = vsel %vm444_vm1, %v2988_v45, -inf }
 0x13a   :  { %v2995_v15 = vpop.eup %2517  ;;  %2523 = vpow2.f32 %v749_v16  ;;  %v626_v26 = vmax.f32 %v624_v52, %v625_v51  ;;  %v644_v7 = vrot.slane %v643_v55, 2  ;;  %v665_v20 = vrot.slane %v664_v23, 2 }
 0x13b   :  { %v755_v58 = vmul.f32 1.442695, %v696_v5  ;;  %v661_v34 = vmax.f32 %v659_v18, %v660_v13  ;;  %v649_v2 = vrot.slane %v648_v35, 4  ;;  %v779_v25 = vsel %vm444_vm1, %v2796_v10, 0.0 }
 0x13c   :  { %v694_v4 = vsub.f32 %v2948_v56, %v626_v26  ;;  %v645_v28 = vmax.f32 %v643_v55, %v644_v7  ;;  %v666_v9 = vmax.f32 %v664_v23, %v665_v20  ;;  %v780_v11 = vrot.slane %v779_v25, 4 }
 0x13d   :  { %2525 = vpow2.f32 %v755_v58  ;;  %v699_v1 = vsub.f32 %v2959_v42, %v661_v34  ;;  %v650_v62 = vmax.f32 %v648_v35, %v649_v2  ;;  %v765_v52 = vsel %vm444_vm1, %v2803_v14, 0.0 }
 0x13e   :  { %v751_v12 = vmul.f32 1.442695, %v694_v4  ;;  %v646_v16 = vrot.slane %v645_v28, 1  ;;  %v667_v5 = vrot.slane %v666_v9, 1  ;;  %v781_v18 = vadd.f32 %v780_v11, %v779_v25 }
 0x13f   :  { %v3003_v51 = vpop.eup %2519  ;;  %v761_v13 = vmul.f32 1.442695, %v699_v1  ;;  %v651_v36 = vrot.slane %v650_v62, 2  ;;  %v766_v57 = vrot.slane %v765_v52, 4  ;;  %v786_v55 = vsel %vm444_vm1, %v2806_v19, 0.0 }
 0x140   :  { %2527 = vpow2.f32 %v751_v12  ;;  %v647_v23 = vmax.f32 %v645_v28, %v646_v16  ;;  %v668_v26 = vmax.f32 %v666_v9, %v667_v5  ;;  %v782_v7 = vrot.slane %v781_v18, 2 }
 0x141   :  { %2529 = vpow2.f32 %v761_v13  ;;  %v652_v35 = vmax.f32 %v650_v62, %v651_v36  ;;  %v767_v20 = vadd.f32 %v766_v57, %v765_v52  ;;  %v787_v58 = vrot.slane %v786_v55, 4 }
 0x142   :  { %v697_v34 = vsub.f32 %v2970_v38, %v647_v23  ;;  %v700_v2 = vsub.f32 %v2974_v33, %v668_v26  ;;  %v783_v25 = vadd.f32 %v782_v7, %v781_v18  ;;  %v772_v4 = vsel %vm444_vm1, %v2816_v29, 0.0 }
 0x143   :  { %v3011_v11 = vpop.eup %2521  ;;  %v653_v1 = vrot.slane %v652_v35, 1  ;;  %v768_v42 = vrot.slane %v767_v20, 2  ;;  %v788_v12 = vadd.f32 %v787_v58, %v786_v55  ;;  %v773_v28 = vrot.slane %v772_v4, 4 }
 0x144   :  { %v3013_v9 = vpop.eup %2523  ;;  %v757_v16 = vmul.f32 1.442695, %v697_v34  ;;  %v763_v36 = vmul.f32 1.442695, %v700_v2  ;;  %v784_v57 = vrot.slane %v783_v25, 1  ;;  %v807_v62 = vsel %vm444_vm1, %v2828_v59, 0.0 }
 0x145   :  { %v654_v52 = vmax.f32 %v652_v35, %v653_v1  ;;  %v769_v5 = vadd.f32 %v768_v42, %v767_v20  ;;  %v789_v18 = vrot.slane %v788_v12, 2  ;;  %v774_v13 = vadd.f32 %v773_v28, %v772_v4 }
 0x146   :  { %2531 = vpow2.f32 %v757_v16  ;;  %v785_v23 = vadd.f32 %v784_v57, %v783_v25  ;;  %v808_v26 = vrot.slane %v807_v62, 4  ;;  %v835_v7 = vsel %vm444_vm1, %v2873_v30, 0.0 }
 0x147   :  { %v3019_v55 = vpop.eup %2525  ;;  %2533 = vpow2.f32 %v763_v36  ;;  %v698_v58 = vsub.f32 %v2988_v45, %v654_v52  ;;  %v770_v34 = vrot.slane %v769_v5, 1  ;;  %v790_v2 = vadd.f32 %v789_v18, %v788_v12 }
 0x148   :  { %2535 = vrcp.f32 %v785_v23  ;;  %v775_v33 = vrot.slane %v774_v13, 2  ;;  %v809_v38 = vadd.f32 %v808_v26, %v807_v62  ;;  %v836_v35 = vrot.slane %v835_v7, 4 }
 0x149   :  { %v759_v42 = vmul.f32 1.442695, %v698_v58  ;;  %v771_v20 = vadd.f32 %v770_v34, %v769_v5  ;;  %v791_v4 = vrot.slane %v790_v2, 1  ;;  %v793_v25 = vsel %vm444_vm1, %v2831_v0, 0.0 }
 0x14a   :  { %v3024_v1 = vpop.eup %2527  ;;  %v776_v28 = vadd.f32 %v775_v33, %v774_v13  ;;  %v810_v16 = vrot.slane %v809_v38, 2  ;;  %v837_v57 = vadd.f32 %v836_v35, %v835_v7  ;;  %v794_v36 = vrot.slane %v793_v25, 4 }
 0x14b   :  { %v3026_v56 = vpop.eup %2529  ;;  %2537 = vpow2.f32 %v759_v42  ;;  %v792_v12 = vadd.f32 %v791_v4, %v790_v2  ;;  %v821_v62 = vsel %vm444_vm1, %v2879_v47, 0.0  ;;  %v814_v52 = vsel %vm444_vm1, %v2836_v8, 0.0 }
 0x14c   :  { %2539 = vrcp.f32 %v771_v20  ;;  %v777_v5 = vrot.slane %v776_v28, 1  ;;  %v811_v18 = vadd.f32 %v810_v16, %v809_v38  ;;  %v838_v23 = vrot.slane %v837_v57, 2 }
 0x14d   :  { %2541 = vrcp.f32 %v792_v12  ;;  %v795_v26 = vadd.f32 %v794_v36, %v793_v25  ;;  %v822_v33 = vrot.slane %v821_v62, 4  ;;  %v815_v13 = vrot.slane %v814_v52, 4 }
 0x14e   :  { %v778_v7 = vadd.f32 %v777_v5, %v776_v28  ;;  %v812_v58 = vrot.slane %v811_v18, 1  ;;  %v839_v34 = vadd.f32 %v838_v23, %v837_v57  ;;  %v842_v2 = vsel %vm444_vm1, %v2884_v54, 0.0 }
 0x14f   :  { %v796_v35 = vrot.slane %v795_v26, 2  ;;  %v823_v42 = vadd.f32 %v822_v33, %v821_v62  ;;  %v816_v4 = vadd.f32 %v815_v13, %v814_v52  ;;  %v843_v45 = vrot.slane %v842_v2, 4 }
 0x150   :  { %v3034_v6 = vpop.eup %2531  ;;  %2543 = vrcp.f32 %v778_v7  ;;  %v813_v20 = vadd.f32 %v812_v58, %v811_v18  ;;  %v840_v38 = vrot.slane %v839_v34, 1  ;;  %v800_v25 = vsel %vm444_vm1, %v2849_v50, 0.0 }
 0x151   :  { %v3038_v16 = vpop.eup %2533  ;;  %v797_v28 = vadd.f32 %v796_v35, %v795_v26  ;;  %v824_v36 = vrot.slane %v823_v42, 2  ;;  %v817_v57 = vrot.slane %v816_v4, 2  ;;  %v844_v12 = vadd.f32 %v843_v45, %v842_v2 }
 0x152   :  { %v2536_v5 = vpop.eup %2535  ;;  %2545 = vrcp.f32 %v813_v20  ;;  %v841_v23 = vadd.f32 %v840_v38, %v839_v34  ;;  %v801_v62 = vrot.slane %v800_v25, 4  ;;  %v828_v52 = vsel %vm444_vm1, %v2900_v17, 0.0 }
 0x153   :  { %v994_v33 = vmul.f32 0.25, %v2536_v5  ;;  %v798_v13 = vrot.slane %v797_v28, 1  ;;  %v825_v18 = vadd.f32 %v824_v36, %v823_v42  ;;  %v818_v7 = vadd.f32 %v817_v57, %v816_v4 }
 0x154   :  { %2547 = vrcp.f32 %v841_v23  ;;  %v845_v58 = vrot.slane %v844_v12, 2  ;;  %v802_v53 = vadd.f32 %v801_v62, %v800_v25  ;;  %v829_v49 = vrot.slane %v828_v52, 4 }
 0x155   :  { %v3042_v48 = vpop.eup %2537  ;;  %v1055_v26 = vmul.f32 %v2796_v10, %v994_v33  ;;  %v799_v45 = vadd.f32 %v798_v13, %v797_v28  ;;  %v826_v2 = vrot.slane %v825_v18, 1  ;;  %v819_v35 = vrot.slane %v818_v7, 1 }
 0x156   :  { %v2540_v34 = vpop.eup %2539  ;;  %v846_v20 = vadd.f32 %v845_v58, %v844_v12  ;;  %v803_v38 = vrot.slane %v802_v53, 2  ;;  %v830_v43 = vadd.f32 %v829_v49, %v828_v52  ;;  %v863_v5 = vsel %vm444_vm1, %v2911_v63, 0.0 }
 0x157   :  { %v2542_v42 = vpop.eup %2541  ;;  %v1091_v4 = vsel %vm444_vm1, %v1055_v26, 0.0  ;;  %v990_v36 = vmul.f32 0.25, %v2540_v34  ;;  %2549 = vrcp.f32 %v799_v45  ;;  %v827_v25 = vadd.f32 %v826_v2, %v825_v18 }
 0x158   :  { %1092 = vadd.xlane.f32.xlu0 %v1091_v4  ;;  %v996_v57 = vmul.f32 0.25, %v2542_v42  ;;  %v820_v23 = vadd.f32 %v819_v35, %v818_v7  ;;  %v847_v10 = vrot.slane %v846_v20, 1  ;;  %v804_v28 = vadd.f32 %v803_v38, %v802_v53 }
 0x159   :  { %v1053_v62 = vmul.f32 %v2803_v14, %v990_v36  ;;  %2551 = vrcp.f32 %v827_v25  ;;  %v831_v12 = vrot.slane %v830_v43, 2  ;;  %v864_v33 = vrot.slane %v863_v5, 4 }
 0x15a   :  { %v2544_v49 = vpop.eup %2543  ;;  %v1056_v52 = vmul.f32 %v2806_v19, %v996_v57  ;;  %2553 = vrcp.f32 %v820_v23  ;;  %v848_v13 = vadd.f32 %v847_v10, %v846_v20  ;;  %v805_v58 = vrot.slane %v804_v28, 1 }
 0x15b   :  { %v1085_v26 = vsel %vm444_vm1, %v1053_v62, 0.0  ;;  %v992_v45 = vmul.f32 0.25, %v2544_v49  ;;  %v832_v18 = vadd.f32 %v831_v12, %v830_v43  ;;  %v865_v2 = vadd.f32 %v864_v33, %v863_v5 }
 0x15c   :  { %v2546_v34 = vpop.eup %2545  ;;  %1086 = vadd.xlane.f32.xlu0 %v1085_v26  ;;  %v1094_v53 = vsel %vm444_vm1, %v1056_v52, 0.0  ;;  %2555 = vrcp.f32 %v848_v13  ;;  %v806_v14 = vadd.f32 %v805_v58, %v804_v28  ;;  %v891_v7 = vsel %vm444_vm1, %v2953_v60, 0.0 }
 0x15d   :  { %v1054_v35 = vmul.f32 %v2816_v29, %v992_v45  ;;  %v1002_v19 = vmul.f32 0.25, %v2546_v34  ;;  %v833_v38 = vrot.slane %v832_v18, 1  ;;  %v866_v20 = vrot.slane %v865_v2, 2 }
 0x15e   :  { %v2548_v42 = vpop.eup %2547  ;;  %2557 = vrcp.f32 %v806_v14  ;;  %v892_v4 = vrot.slane %v891_v7, 4  ;;  %v849_v43 = vsel %vm444_vm1, %v2919_v3, 0.0  ;;  %v877_v5 = vsel %vm444_vm1, %v2961_v21, 0.0 }
 0x15f   :  { %v1088_v36 = vsel %vm444_vm1, %v1054_v35, 0.0  ;;  %v1059_v25 = vmul.f32 %v2828_v59, %v1002_v19  ;;  %v1010_v57 = vmul.f32 0.25, %v2548_v42  ;;  %v834_v23 = vadd.f32 %v833_v38, %v832_v18 }
 0x160   :  { %1095 = vadd.xlane.f32.xlu0 %v1094_v53  ;;  %v867_v29 = vadd.f32 %v866_v20, %v865_v2  ;;  %v893_v10 = vadd.f32 %v892_v4, %v891_v7  ;;  %v850_v28 = vrot.slane %v849_v43, 4  ;;  %v878_v62 = vrot.slane %v877_v5, 4 }
 0x161   :  { %v2550_v12 = vpop.eup %2549  ;;  %v1103_v33 = vsel %vm444_vm1, %v1059_v25, 0.0  ;;  %v1063_v49 = vmul.f32 %v2873_v30, %v1010_v57  ;;  %2559 = vrcp.f32 %v834_v23  ;;  %v870_v52 = vsel %vm444_vm1, %v2923_v37, 0.0 }
 0x162   :  { %v998_v13 = vmul.f32 0.25, %v2550_v12  ;;  %v868_v58 = vrot.slane %v867_v29, 1  ;;  %v894_v26 = vrot.slane %v893_v10, 2  ;;  %v851_v59 = vadd.f32 %v850_v28, %v849_v43 }
 0x163   :  { %v2552_v45 = vpop.eup %2551  ;;  %v1115_v18 = vsel %vm444_vm1, %v1063_v49, 0.0  ;;  %v879_v2 = vadd.f32 %v878_v62, %v877_v5  ;;  %v871_v34 = vrot.slane %v870_v52, 4  ;;  %v898_v53 = vsel %vm444_vm1, %v2965_v46, 0.0 }
 0x164   :  { %v2554_v14 = vpop.eup %2553  ;;  %1089 = vadd.xlane.f32.xlu0 %v1088_v36  ;;  %1116 = vadd.xlane.f32.xlu1 %v1115_v18  ;;  %v1057_v30 = vmul.f32 %v2831_v0, %v998_v13  ;;  %v1006_v7 = vmul.f32 0.25, %v2552_v45  ;;  %v869_v35 = vadd.f32 %v868_v58, %v867_v29  ;;  %v895_v19 = vadd.f32 %v894_v26, %v893_v10 }
 0x165   :  { %v1004_v38 = vmul.f32 0.25, %v2554_v14  ;;  %v852_v20 = vrot.slane %v851_v59, 2  ;;  %v880_v42 = vrot.slane %v879_v2, 2  ;;  %v872_v4 = vadd.f32 %v871_v34, %v870_v52 }
 0x166   :  { %v2556_v43 = vpop.eup %2555  ;;  %v1097_v25 = vsel %vm444_vm1, %v1057_v30, 0.0  ;;  %v1061_v5 = vmul.f32 %v2879_v47, %v1006_v7  ;;  %2561 = vrcp.f32 %v869_v35  ;;  %v896_v57 = vrot.slane %v895_v19, 1 }
 0x167   :  { %v1060_v23 = vmul.f32 %v2836_v8, %v1004_v38  ;;  %v1012_v36 = vmul.f32 0.25, %v2556_v43  ;;  %v853_v28 = vadd.f32 %v852_v20, %v851_v59  ;;  %v881_v62 = vadd.f32 %v880_v42, %v879_v2 }
 0x168   :  { %v2558_v0 = vpop.eup %2557  ;;  %1104 = vadd.xlane.f32.xlu0 %v1103_v33  ;;  %v1109_v29 = vsel %vm444_vm1, %v1061_v5, 0.0  ;;  %v897_v10 = vadd.f32 %v896_v57, %v895_v19  ;;  %v873_v12 = vrot.slane %v872_v4, 2  ;;  %v899_v49 = vrot.slane %v898_v53, 4 }
 0x169   :  { %1110 = vadd.xlane.f32.xlu1 %v1109_v29  ;;  %v1106_v52 = vsel %vm444_vm1, %v1060_v23, 0.0  ;;  %v1064_v13 = vmul.f32 %v2884_v54, %v1012_v36  ;;  %v1000_v47 = vmul.f32 0.25, %v2558_v0  ;;  %v854_v58 = vrot.slane %v853_v28, 1 }
 0x16a   :  { %2563 = vrcp.f32 %v897_v10  ;;  %v882_v26 = vrot.slane %v881_v62, 1  ;;  %v874_v8 = vadd.f32 %v873_v12, %v872_v4  ;;  %v900_v45 = vadd.f32 %v899_v49, %v898_v53 }
 0x16b   :  { %v2560_v59 = vpop.eup %2559  ;;  %v1118_v18 = vsel %vm444_vm1, %v1064_v13, 0.0  ;;  %v1058_v33 = vmul.f32 %v2849_v50, %v1000_v47  ;;  %v855_v2 = vadd.f32 %v854_v58, %v853_v28  ;;  %v856_v34 = vsel %vm444_vm1, %v2934_v41, 0.0 }
 0x16c   :  { %1098 = vadd.xlane.f32.xlu0 %v1097_v25  ;;  %v1008_v14 = vmul.f32 0.25, %v2560_v59  ;;  %v883_v30 = vadd.f32 %v882_v26, %v881_v62  ;;  %v875_v7 = vrot.slane %v874_v8, 1  ;;  %v901_v54 = vrot.slane %v900_v45, 2 }
 0x16d   :  { %1119 = vadd.xlane.f32.xlu1 %v1118_v18  ;;  %v1100_v35 = vsel %vm444_vm1, %v1058_v33, 0.0  ;;  %2565 = vrcp.f32 %v855_v2  ;;  %v857_v19 = vrot.slane %v856_v34, 4  ;;  %v905_v53 = vsel %vm444_vm1, %v2990_v32, 0.0 }
 0x16e   :  { %v1062_v38 = vmul.f32 %v2900_v17, %v1008_v14  ;;  %2567 = vrcp.f32 %v883_v30  ;;  %v876_v50 = vadd.f32 %v875_v7, %v874_v8  ;;  %v902_v20 = vadd.f32 %v901_v54, %v900_v45 }
 0x16f   :  { %v858_v42 = vadd.f32 %v857_v19, %v856_v34  ;;  %v906_v4 = vrot.slane %v905_v53, 4  ;;  %v884_v43 = vsel %vm444_vm1, %v2976_v39, 0.0  ;;  %v912_v25 = vsel %vm444_vm1, %v3003_v51, 0.0 }
 0x170   :  { %v2562_v5 = vpop.eup %2561  ;;  %1107 = vadd.xlane.f32.xlu0 %v1106_v52  ;;  %v1112_v57 = vsel %vm444_vm1, %v1062_v38, 0.0  ;;  %2569 = vrcp.f32 %v876_v50  ;;  %v903_v23 = vrot.slane %v902_v20, 1  ;;  %v885_v36 = vrot.slane %v884_v43, 4 }
 0x171   :  { %1113 = vadd.xlane.f32.xlu1 %v1112_v57  ;;  %v1018_v17 = vmul.f32 0.25, %v2562_v5  ;;  %v859_v28 = vrot.slane %v858_v42, 2  ;;  %v907_v62 = vadd.f32 %v906_v4, %v905_v53  ;;  %v913_v0 = vrot.slane %v912_v25, 4 }
 0x172   :  { %v904_v29 = vadd.f32 %v903_v23, %v902_v20  ;;  %v886_v10 = vadd.f32 %v885_v36, %v884_v43  ;;  %v947_v12 = vsel %vm444_vm1, %v3011_v11, 0.0  ;;  %v933_v49 = vsel %vm444_vm1, %v3013_v9, 0.0 }
 0x173   :  { %v1067_v52 = vmul.f32 %v2911_v63, %v1018_v17  ;;  %v860_v13 = vadd.f32 %v859_v28, %v858_v42  ;;  %v908_v47 = vrot.slane %v907_v62, 2  ;;  %v914_v58 = vadd.f32 %v913_v0, %v912_v25 }
 0x174   :  { %v2564_v26 = vpop.eup %2563  ;;  %1101 = vadd.xlane.f32.xlu0 %v1100_v35  ;;  %2571 = vrcp.f32 %v904_v29  ;;  %v887_v8 = vrot.slane %v886_v10, 2  ;;  %v948_v45 = vrot.slane %v947_v12, 4  ;;  %v934_v59 = vrot.slane %v933_v49, 4 }
 0x175   :  { %v1127_v18 = vsel %vm444_vm1, %v1067_v52, 0.0  ;;  %v1026_v33 = vmul.f32 0.25, %v2564_v26  ;;  %v861_v2 = vrot.slane %v860_v13, 1  ;;  %v909_v34 = vadd.f32 %v908_v47, %v907_v62 }
 0x176   :  { %1128 = vadd.xlane.f32.xlu1 %v1127_v18  ;;  %v888_v14 = vadd.f32 %v887_v8, %v886_v10  ;;  %v915_v30 = vrot.slane %v914_v58, 2  ;;  %v949_v7 = vadd.f32 %v948_v45, %v947_v12  ;;  %v935_v54 = vadd.f32 %v934_v59, %v933_v49 }
 0x177   :  { %v2566_v63 = vpop.eup %2565  ;;  %v1071_v19 = vmul.f32 %v2953_v60, %v1026_v33  ;;  %v862_v53 = vadd.f32 %v861_v2, %v860_v13  ;;  %v910_v38 = vrot.slane %v909_v34, 1  ;;  %v919_v35 = vsel %vm444_vm1, %v2983_v61, 0.0 }
 0x178   :  { %v2568_v50 = vpop.eup %2567  ;;  %v1014_v20 = vmul.f32 0.25, %v2566_v63  ;;  %v889_v42 = vrot.slane %v888_v14, 1  ;;  %v916_v4 = vadd.f32 %v915_v30, %v914_v58  ;;  %v950_v43 = vrot.slane %v949_v7, 2 }
 0x179   :  { %v1139_v25 = vsel %vm444_vm1, %v1071_v19, 0.0  ;;  %v1022_v5 = vmul.f32 0.25, %v2568_v50  ;;  %2573 = vrcp.f32 %v862_v53  ;;  %v911_v57 = vadd.f32 %v910_v38, %v909_v34 }
 0x17a   :  { %v2570_v23 = vpop.eup %2569  ;;  %1140 = vadd.xlane.f32.xlu0 %v1139_v25  ;;  %v1065_v36 = vmul.f32 %v2919_v3, %v1014_v20  ;;  %v890_v60 = vadd.f32 %v889_v42, %v888_v14  ;;  %v917_v17 = vrot.slane %v916_v4, 1  ;;  %v951_v28 = vadd.f32 %v950_v43, %v949_v7 }
 0x17b   :  { %v1069_v62 = vmul.f32 %v2961_v21, %v1022_v5  ;;  %v1020_v0 = vmul.f32 0.25, %v2570_v23  ;;  %2575 = vrcp.f32 %v911_v57  ;;  %v936_v29 = vrot.slane %v935_v54, 2 }
 0x17c   :  { %v1121_v10 = vsel %vm444_vm1, %v1065_v36, 0.0  ;;  %2577 = vrcp.f32 %v890_v60  ;;  %v918_v12 = vadd.f32 %v917_v17, %v916_v4  ;;  %v952_v49 = vrot.slane %v951_v28, 1 }
 0x17d   :  { %1122 = vadd.xlane.f32.xlu1 %v1121_v10  ;;  %v1133_v52 = vsel %vm444_vm1, %v1069_v62, 0.0  ;;  %v1068_v13 = vmul.f32 %v2923_v37, %v1020_v0  ;;  %v937_v47 = vadd.f32 %v936_v29, %v935_v54  ;;  %v920_v3 = vrot.slane %v919_v35, 4 }
 0x17e   :  { %v2572_v58 = vpop.eup %2571  ;;  %1134 = vadd.xlane.f32.xlu0 %v1133_v52  ;;  %2579 = vrcp.f32 %v918_v12  ;;  %v953_v26 = vadd.f32 %v952_v49, %v951_v28  ;;  %v954_v21 = vsel %vm444_vm1, %v3019_v55, 0.0  ;;  %v926_v8 = vsel %vm444_vm1, %v2995_v15, 0.0 }
 0x17f   :  { %v1130_v45 = vsel %vm444_vm1, %v1068_v13, 0.0  ;;  %v1028_v59 = vmul.f32 0.25, %v2572_v58  ;;  %v938_v18 = vrot.slane %v937_v47, 1  ;;  %v921_v33 = vadd.f32 %v920_v3, %v919_v35 }
 0x180   :  { %2581 = vrcp.f32 %v953_v26  ;;  %v955_v2 = vrot.slane %v954_v21, 4  ;;  %v927_v37 = vrot.slane %v926_v8, 4  ;;  %v940_v34 = vsel %vm444_vm1, %v3024_v1, 0.0 }
 0x181   :  { %1131 = vadd.xlane.f32.xlu1 %v1130_v45  ;;  %v1072_v14 = vmul.f32 %v2965_v46, %v1028_v59  ;;  %v939_v30 = vadd.f32 %v938_v18, %v937_v47  ;;  %v922_v7 = vrot.slane %v921_v33, 2  ;;  %v941_v54 = vrot.slane %v940_v34, 4 }
 0x182   :  { %v956_v63 = vadd.f32 %v955_v2, %v954_v21  ;;  %v928_v19 = vadd.f32 %v927_v37, %v926_v8  ;;  %v975_v53 = vsel %vm444_vm1, %v3026_v56, 0.0  ;;  %v961_v38 = vsel %vm444_vm1, %v3034_v6, 0.0 }
 0x183   :  { %v2574_v35 = vpop.eup %2573  ;;  %v1142_v50 = vsel %vm444_vm1, %v1072_v14, 0.0  ;;  %2583 = vrcp.f32 %v939_v30  ;;  %v923_v20 = vadd.f32 %v922_v7, %v921_v33  ;;  %v942_v42 = vadd.f32 %v941_v54, %v940_v34 }
 0x184   :  { %1143 = vadd.xlane.f32.xlu0 %v1142_v50  ;;  %v1016_v4 = vmul.f32 0.25, %v2574_v35  ;;  %v957_v46 = vrot.slane %v956_v63, 2  ;;  %v929_v43 = vrot.slane %v928_v19, 2  ;;  %v976_v25 = vrot.slane %v975_v53, 4 }
 0x185   :  { %v2576_v5 = vpop.eup %2575  ;;  %v924_v57 = vrot.slane %v923_v20, 1  ;;  %v943_v23 = vrot.slane %v942_v42, 2  ;;  %v962_v36 = vrot.slane %v961_v38, 4  ;;  %v968_v60 = vsel %vm444_vm1, %v3042_v48, 0.0 }
 0x186   :  { %v2578_v17 = vpop.eup %2577  ;;  %v1066_v28 = vmul.f32 %v2934_v41, %v1016_v4  ;;  %v1030_v62 = vmul.f32 0.25, %v2576_v5  ;;  %v958_v0 = vadd.f32 %v957_v46, %v956_v63  ;;  %v930_v29 = vadd.f32 %v929_v43, %v928_v19 }
 0x187   :  { %v1024_v10 = vmul.f32 0.25, %v2578_v17  ;;  %v925_v12 = vadd.f32 %v924_v57, %v923_v20  ;;  %v944_v49 = vadd.f32 %v943_v23, %v942_v42  ;;  %v977_v52 = vadd.f32 %v976_v25, %v975_v53 }
 0x188   :  { %v2580_v13 = vpop.eup %2579  ;;  %v1124_v47 = vsel %vm444_vm1, %v1066_v28, 0.0  ;;  %v1073_v3 = vmul.f32 %v2990_v32, %v1030_v62  ;;  %v959_v58 = vrot.slane %v958_v0, 1  ;;  %v931_v26 = vrot.slane %v930_v29, 1 }
 0x189   :  { %1125 = vadd.xlane.f32.xlu1 %v1124_v47  ;;  %v1070_v21 = vmul.f32 %v2976_v39, %v1024_v10  ;;  %v1032_v8 = vmul.f32 0.25, %v2580_v13  ;;  %2585 = vrcp.f32 %v925_v12  ;;  %v945_v41 = vrot.slane %v944_v49, 1 }
 0x18a   :  { %v2582_v45 = vpop.eup %2581  ;;  %v1145_v59 = vsel %vm444_vm1, %v1073_v3, 0.0  ;;  %v960_v18 = vadd.f32 %v959_v58, %v958_v0  ;;  %v932_v33 = vadd.f32 %v931_v26, %v930_v29  ;;  %v978_v2 = vrot.slane %v977_v52, 2 }
 0x18b   :  { %1146 = vadd.xlane.f32.xlu0 %v1145_v59  ;;  %v1136_v37 = vsel %vm444_vm1, %v1070_v21, 0.0  ;;  %v1074_v34 = vmul.f32 %v3003_v51, %v1032_v8  ;;  %v1042_v32 = vmul.f32 0.25, %v2582_v45  ;;  %v946_v14 = vadd.f32 %v945_v41, %v944_v49 }
 0x18c   :  { %2587 = vrcp.f32 %v960_v18  ;;  %v979_v30 = vadd.f32 %v978_v2, %v977_v52  ;;  %v963_v7 = vadd.f32 %v962_v36, %v961_v38  ;;  %v969_v39 = vrot.slane %v968_v60, 4 }
 0x18d   :  { %v2584_v54 = vpop.eup %2583  ;;  %1137 = vadd.xlane.f32.xlu1 %v1136_v37  ;;  %v1148_v63 = vsel %vm444_vm1, %v1074_v34, 0.0  ;;  %v1079_v19 = vmul.f32 %v3011_v11, %v1042_v32  ;;  %2589 = vrcp.f32 %v932_v33  ;;  %v982_v53 = vsel %vm444_vm1, %v3038_v16, 0.0 }
 0x18e   :  { %v1038_v35 = vmul.f32 0.25, %v2584_v54  ;;  %2591 = vrcp.f32 %v946_v14  ;;  %v980_v50 = vrot.slane %v979_v30, 1  ;;  %v964_v51 = vrot.slane %v963_v7, 2 }
 0x18f   :  { %1149 = vadd.xlane.f32.xlu0 %v1148_v63  ;;  %v970_v20 = vadd.f32 %v969_v39, %v968_v60  ;;  %v983_v42 = vrot.slane %v982_v53, 4  ;;  %v1163_v38 = vsel %vm444_vm1, %v1079_v19, 0.0  ;;  %v2457_v19 = vld [vmem:[%s3623_s1 + $0x40] sm:$0xff]  }
 0x190   :  { %v1077_v4 = vmul.f32 %v3013_v9, %v1038_v35  ;;  %v981_v46 = vadd.f32 %v980_v50, %v979_v30  ;;  %v965_v43 = vadd.f32 %v964_v51, %v963_v7  ;;  %v2460_v35 = vld [vmem:[%s3623_s1 + $0x58] sm:$0xff]   ;;  %v2461_v50 = vld [vmem:[%s3623_s1 + $0x60] sm:$0xff]   ;;  %v2462_v51 = vld [vmem:[%s3623_s1 + $0x68] sm:$0xff]  }
 0x191   :  { %1164 = vadd.xlane.f32.xlu1 %v1163_v38  ;;  %v971_v25 = vrot.slane %v970_v20, 2  ;;  %v984_v11 = vadd.f32 %v983_v42, %v982_v53  ;;  %v2459_v53 = vld [vmem:[%s3623_s1 + $0x50] sm:$0xff]  }
 0x192   :  { %v1157_v5 = vsel %vm444_vm1, %v1077_v4, 0.0  ;;  %2593 = vrcp.f32 %v981_v46  ;;  %v966_v57 = vrot.slane %v965_v43, 1 }
 0x193   :  { %v2586_v23 = vpop.eup %2585  ;;  %1158 = vadd.xlane.f32.xlu0 %v1157_v5  ;;  %v972_v36 = vadd.f32 %v971_v25, %v970_v20  ;;  %v985_v17 = vrot.slane %v984_v11, 2 }
 0x194   :  { %v1034_v28 = vmul.f32 0.25, %v2586_v23  ;;  %v967_v60 = vadd.f32 %v966_v57, %v965_v43  ;;  %v1437_v23 = vlaneseq }
 0x195   :  { %v973_v62 = vrot.slane %v972_v36, 1  ;;  %v986_v0 = vadd.f32 %v985_v17, %v984_v11 }
 0x196   :  { %v2588_v29 = vpop.eup %2587  ;;  %v1075_v9 = vmul.f32 %v2983_v61, %v1034_v28  ;;  %2595 = vrcp.f32 %v967_v60 }
 0x197   :  { %v2590_v10 = vpop.eup %2589  ;;  %v1044_v12 = vmul.f32 0.25, %v2588_v29  ;;  %v974_v49 = vadd.f32 %v973_v62, %v972_v36  ;;  %v987_v52 = vrot.slane %v986_v0, 1  ;;  %v3188_v29 = vand.u32 127, %v1437_v23 }
 0x198   :  { %v2592_v13 = vpop.eup %2591  ;;  %v1151_v47 = vsel %vm444_vm1, %v1075_v9, 0.0  ;;  %v1036_v3 = vmul.f32 0.25, %v2590_v10 }
 0x199   :  { %1152 = vadd.xlane.f32.xlu0 %v1151_v47  ;;  %v1080_v58 = vmul.f32 %v3019_v55, %v1044_v12  ;;  %v1040_v26 = vmul.f32 0.25, %v2592_v13  ;;  %2597 = vrcp.f32 %v974_v49  ;;  %v988_v21 = vadd.f32 %v987_v52, %v986_v0 }
 0x19a   :  { %v1076_v8 = vmul.f32 %v2995_v15, %v1036_v3  ;;  %v3186_v0 = vshrl.u32 %v1437_v23, 7 }
 0x19b   :  { %v1166_v41 = vsel %vm444_vm1, %v1080_v58, 0.0  ;;  %v1078_v61 = vmul.f32 %v3024_v1, %v1040_v26  ;;  %2599 = vrcp.f32 %v988_v21  ;;  %v3680_v21 = vld [vmem:[#allocation5_spill] sm:$0xff] }
 0x19c   :  { %v2594_v45 = vpop.eup %2593  ;;  %1167 = vadd.xlane.f32.xlu1 %v1166_v41  ;;  %v1154_v59 = vsel %vm444_vm1, %v1076_v8, 0.0 }
 0x19d   :  { %1155 = vadd.xlane.f32.xlu0 %v1154_v59  ;;  %v1050_v18 = vmul.f32 0.25, %v2594_v45  ;;  %v1160_v33 = vsel %vm444_vm1, %v1078_v61, 0.0  ;;  %v3681_v59 = vld [vmem:[#allocation2_spill] sm:$0xff] }
 0x19f   :  { %v1083_v55 = vmul.f32 %v3026_v56, %v1050_v18 }
 0x1a0   :  { %v2596_v2 = vpop.eup %2595  ;;  %1161 = vadd.xlane.f32.xlu1 %v1160_v33 }
 0x1a1   :  { %v1046_v37 = vmul.f32 0.25, %v2596_v2  ;;  %v1175_v15 = vsel %vm444_vm1, %v1083_v55, 0.0 }
 0x1a3   :  { %v2598_v34 = vpop.eup %2597  ;;  %v1081_v32 = vmul.f32 %v3034_v6, %v1046_v37  ;;  %v2455_v6 = vld [vmem:[%s3623_s1 + $0x30] sm:$0xff]  }
 0x1a4   :  { %1176 = vadd.xlane.f32.xlu1 %v1175_v15  ;;  %v1048_v1 = vmul.f32 0.25, %v2598_v34  ;;  %2385 = vmatprep.subr.bf16.mxu1 %v2455_v6  ;;  %v3682_v15 = vld [vmem:[#allocation6_spill] sm:$0xff] }
 0x1a5   :  { %v2600_v14 = vpop.eup %2599  ;;  %v1169_v30 = vsel %vm444_vm1, %v1081_v32, 0.0  ;;  %2386 = vmatpush3.bf16.msra.mxu1 %v2455_v6 }
 0x1a6   :  { %v1082_v7 = vmul.f32 %v3042_v48, %v1048_v1  ;;  %v1052_v39 = vmul.f32 0.25, %v2600_v14  ;;  %v2456_v48 = vld [vmem:[%s3623_s1 + $0x38] sm:$0xff]  }
 0x1a7   :  { %2387 = vmatprep.subr.bf16.mxu1 %v2456_v48 }
 0x1a8   :  { %1170 = vadd.xlane.f32.xlu1 %v1169_v30  ;;  %v1172_v54 = vsel %vm444_vm1, %v1082_v7, 0.0  ;;  %v1084_v56 = vmul.f32 %v3038_v16, %v1052_v39  ;;  %v2458_v16 = vld [vmem:[%s3623_s1 + $0x48] sm:$0xff]  }
 0x1a9   :  { %2388 = vmatpush3.bf16.msra.mxu1 %v2456_v48 }
 0x1aa   :  { %v1178_v63 = vsel %vm444_vm1, %v1084_v56, 0.0  ;;  %2389 = vmatprep.subr.bf16.mxu1 %v2457_v19 }
 0x1ac   :  { %1173 = vadd.xlane.f32.xlu1 %v1172_v54 }
 0x1ad   :  { %2390 = vmatpush3.bf16.msra.mxu1 %v2457_v19 }
 0x1ae   :  { %2391 = vmatprep.subr.bf16.mxu1 %v2458_v16 }
 0x1b0   :  { %1179 = vadd.xlane.f32.xlu1 %v1178_v63 }
 0x1b1   :  { %2392 = vmatpush3.bf16.msra.mxu1 %v2458_v16 }
 0x1b2   :  { %2393 = vmatprep.subr.bf16.mxu1 %v2459_v53 }
 0x1b5   :  { %2394 = vmatpush3.bf16.msra.mxu1 %v2459_v53  ;;  %v3683_v53 = vld [vmem:[#allocation3_spill] sm:$0xff] }
 0x1b6   :  { %2395 = vmatprep.subr.bf16.mxu1 %v2460_v35 }
 0x1b9   :  { %2396 = vmatpush3.bf16.msra.mxu1 %v2460_v35 }
 0x1ba   :  { %2397 = vmatprep.subr.bf16.mxu1 %v2461_v50 }
 0x1bd   :  { %2398 = vmatpush3.bf16.msra.mxu1 %v2461_v50 }
 0x1be   :  { %2399 = vmatprep.subr.bf16.mxu1 %v2462_v51 }
 0x1c1   :  { %2400 = vmatpush3.bf16.msra.mxu1 %v2462_v51 }
 0x1e5   :  { %v3172_v20 = vpop.xlane.xlu0 %1092 }
 0x1e6   :  { %v1183_v42 = vmul.f32 %v3172_v20, %v2732_v22 }
 0x1e8   :  { %v1225_v4 = vrot.slane %v1183_v42, 4 }
 0x1e9   :  { %v1087_v38 = vpop.xlane.xlu0 %1086 }
 0x1ea   :  { %v1181_v46 = vmul.f32 %v1087_v38, %v2735_v24  ;;  %v1226_v11 = vadd.f32 %v1225_v4, %v1183_v42 }
 0x1ec   :  { %v1213_v43 = vrot.slane %v1181_v46, 4  ;;  %v1227_v22 = vrot.slane %v1226_v11, 2 }
 0x1ed   :  { %v3177_v25 = vpop.xlane.xlu0 %1095 }
 0x1ee   :  { %v1184_v5 = vmul.f32 %v3177_v25, %v2740_v27  ;;  %v1214_v57 = vadd.f32 %v1213_v43, %v1181_v46  ;;  %v1228_v12 = vadd.f32 %v1227_v22, %v1226_v11 }
 0x1f0   :  { %v1231_v28 = vrot.slane %v1184_v5, 4  ;;  %v1215_v62 = vrot.slane %v1214_v57, 2  ;;  %v1229_v41 = vrot.slane %v1228_v12, 1 }
 0x1f1   :  { %v1090_v36 = vpop.xlane.xlu0 %1089  ;;  %v3181_v17 = vpop.xlane.xlu1 %1116 }
 0x1f2   :  { %v1182_v60 = vmul.f32 %v1090_v36, %v2745_v31  ;;  %v1191_v24 = vmul.f32 %v3181_v17, %v2776_v40  ;;  %v1232_v49 = vadd.f32 %v1231_v28, %v1184_v5  ;;  %v1216_v47 = vadd.f32 %v1215_v62, %v1214_v57  ;;  %v3684_v62 = vld [vmem:[#allocation4_spill] sm:$0xff] }
 0x1f3   :  { %v3196_v31 = vsub.s32 %v3188_v29, %v3186_v0  ;;  %v1230_v7 = vadd.f32 %v1229_v41, %v1228_v12 }
 0x1f4   :  { %v1219_v9 = vrot.slane %v1182_v60, 4  ;;  %v1273_v27 = vrot.slane %v1191_v24, 4  ;;  %v1233_v61 = vrot.slane %v1232_v49, 2  ;;  %v1217_v55 = vrot.slane %v1216_v47, 1 }
 0x1f5   :  { %v3190_v10 = vpop.xlane.xlu0 %1104  ;;  %v1760_v45 = vrot.slane %v1090_v36, %v3196_v31  ;;  %v1764_v6 = vrot.slane %v3172_v20, %v3196_v31  ;;  %v1768_v51 = vrot.slane %v3177_v25, %v3196_v31  ;;  %v1407_v43 = vpack.c.bf16 %v1230_v7, %v1230_v7 }
 0x1f6   :  { %v1220_v52 = vadd.f32 %v1219_v9, %v1182_v60  ;;  %v3192_v13 = vpop.xlane.xlu1 %1110  ;;  %v1187_v40 = vmul.f32 %v3190_v10, %v2752_v44  ;;  %v1274_v58 = vadd.f32 %v1273_v27, %v1191_v24  ;;  %v1756_v44 = vrot.slane %v1087_v38, %v3196_v31 }
 0x1f7   :  { %v1189_v8 = vmul.f32 %v3192_v13, %v3680_v21  ;;  %v1234_v39 = vadd.f32 %v1233_v61, %v1232_v49  ;;  %v1218_v48 = vadd.f32 %v1217_v55, %v1216_v47  ;;  %v1780_v23 = vrot.slane %v3190_v10, %v3196_v31 }
 0x1f8   :  { %v1221_v3 = vrot.slane %v1220_v52, 2  ;;  %v1249_v37 = vrot.slane %v1187_v40, 4  ;;  %v1275_v14 = vrot.slane %v1274_v58, 2  ;;  %v1881_v54 = vsel %vm1505_vm2, %v1760_v45, %v1756_v44 }
 0x1f9   :  { %v1099_v26 = vpop.xlane.xlu0 %1098  ;;  %v1261_v2 = vrot.slane %v1189_v8, 4  ;;  %v1882_v38 = vsel %vm1507_vm3, %v1764_v6, %v1881_v54  ;;  %v1235_v11 = vrot.slane %v1234_v39, 1  ;;  %v1405_v57 = vpack.c.bf16 %v1218_v48, %v1218_v48 }
 0x1fa   :  { %v1185_v18 = vmul.f32 %v1099_v26, %v3681_v59  ;;  %v3204_v33 = vpop.xlane.xlu1 %1119  ;;  %v1222_v1 = vadd.f32 %v1221_v3, %v1220_v52  ;;  %v1250_v16 = vadd.f32 %v1249_v37, %v1187_v40  ;;  %v1276_v4 = vadd.f32 %v1275_v14, %v1274_v58  ;;  %v3685_v52 = vld [vmem:[#allocation7_spill] sm:$0xff] }
 0x1fb   :  { %v1192_v32 = vmul.f32 %v3204_v33, %v3682_v15  ;;  %v1262_v56 = vadd.f32 %v1261_v2, %v1189_v8  ;;  %v1772_v20 = vrot.slane %v1099_v26, %v3196_v31  ;;  %v1883_v60 = vsel %vm1509_vm4, %v1768_v51, %v1882_v38 }
 0x1fc   :  { %v1237_v34 = vrot.slane %v1185_v18, 4  ;;  %v1223_v42 = vrot.slane %v1222_v1, 1  ;;  %v1251_v28 = vrot.slane %v1250_v16, 2  ;;  %v1277_v12 = vrot.slane %v1276_v4, 1 }
 0x1fd   :  { %v1108_v30 = vpop.xlane.xlu0 %1107  ;;  %v1279_v50 = vrot.slane %v1192_v32, 4  ;;  %v1263_v5 = vrot.slane %v1262_v56, 2  ;;  %v1236_v40 = vadd.f32 %v1235_v11, %v1234_v39  ;;  %v1884_v10 = vsel %vm1511_vm5, %v1772_v20, %v1883_v60 }
 0x1fe   :  { %v3210_v63 = vpop.xlane.xlu1 %1113  ;;  %v1238_v19 = vadd.f32 %v1237_v34, %v1185_v18  ;;  %v1188_v35 = vmul.f32 %v1108_v30, %v3683_v53  ;;  %v1224_v27 = vadd.f32 %v1223_v42, %v1222_v1  ;;  %v1784_v58 = vrot.slane %v1108_v30, %v3196_v31  ;;  %v3688_v42 = vld [vmem:[#allocation9_spill] sm:$0xff] }
 0x1ff   :  { %v1280_v22 = vadd.f32 %v1279_v50, %v1192_v32  ;;  %v1190_v47 = vmul.f32 %v3210_v63, %v3685_v52  ;;  %v1264_v3 = vadd.f32 %v1263_v5, %v1262_v56  ;;  %v1796_v45 = vrot.slane %v3181_v17, %v3196_v31 }
 0x200   :  { %v1239_v36 = vrot.slane %v1238_v19, 2  ;;  %v1255_v25 = vrot.slane %v1188_v35, 4  ;;  %v1406_v2 = vpack.c.bf16 %v1224_v27, %v1224_v27  ;;  %v1252_v44 = vadd.f32 %v1251_v28, %v1250_v16 }
 0x201   :  { %v1102_v46 = vpop.xlane.xlu0 %1101  ;;  %v1281_v21 = vrot.slane %v1280_v22, 2  ;;  %v1267_v41 = vrot.slane %v1190_v47, 4  ;;  %v1278_v37 = vadd.f32 %v1277_v12, %v1276_v4  ;;  %v3237_v15 = vunpack.c.l.b16 %v1407_v43 }
 0x202   :  { %v1186_v24 = vmul.f32 %v1102_v46, %v3684_v62  ;;  %v1776_v49 = vrot.slane %v1102_v46, %v3196_v31  ;;  %v1240_v26 = vadd.f32 %v1239_v36, %v1238_v19  ;;  %v1256_v59 = vadd.f32 %v1255_v25, %v1188_v35  ;;  %v3686_v19 = vld [vmem:[#allocation8_spill] sm:$0xff] }
 0x203   :  { %v3223_v9 = vpop.xlane.xlu1 %1128  ;;  %v1265_v32 = vrot.slane %v1264_v3, 1  ;;  %v1788_v1 = vrot.slane %v3192_v13, %v3196_v31  ;;  %v1268_v14 = vadd.f32 %v1267_v41, %v1190_v47  ;;  %v1473_v17 = vunpack.c.l.b16 %v1405_v57  ;;  %v3687_v13 = vld [vmem:[#allocation12_spill] sm:$0xff] }
 0x204   :  { %v1885_v8 = vsel %vm1513_vm6, %v1776_v49, %v1884_v10  ;;  %v1243_v18 = vrot.slane %v1186_v24, 4  ;;  %v1408_v7 = vpack.c.bf16 %v1236_v40, %v1236_v40  ;;  %v1241_v39 = vrot.slane %v1240_v26, 1 }
 0x205   :  { %v1886_v55 = vsel %vm1515_vm7, %v1780_v23, %v1885_v8  ;;  %v1282_v54 = vadd.f32 %v1281_v21, %v1280_v22  ;;  %v1257_v6 = vrot.slane %v1256_v59, 2  ;;  %v1195_v16 = vmul.f32 %v3223_v9, %v3686_v19  ;;  %v3689_v23 = vld [vmem:[#allocation13_spill] sm:$0xff] }
 0x206   :  { %v1887_v34 = vsel %vm1517_vm8, %v1784_v58, %v1886_v55  ;;  %v1244_v48 = vadd.f32 %v1243_v18, %v1186_v24  ;;  %v1474_v35 = vunpack.c.l.b16 %v1406_v2  ;;  %v1253_v50 = vrot.slane %v1252_v44, 1  ;;  %v3690_v18 = vld [vmem:[#allocation14_spill] sm:$0xff] }
 0x207   :  { %v3231_v61 = vpop.xlane.xlu0 %1140  ;;  %1914 = vst.msk [vmem:[%s3626_s3] sm:$0xff] %vm1913_vm9, %v1887_v34  ;;  %v1415_v51 = vpack.c.bf16 %v1278_v37, %v1278_v37  ;;  %v1266_v4 = vadd.f32 %v1265_v32, %v1264_v3  ;;  %v1269_v46 = vrot.slane %v1268_v14, 2  ;;  %v1792_v43 = vrot.slane %v3210_v63, %v3196_v31  ;;  %v3691_v37 = vld [vmem:[#allocation10_spill] sm:$0xff] }
 0x208   :  { %v1199_v53 = vmul.f32 %v3231_v61, %v3687_v13  ;;  %v1242_v20 = vadd.f32 %v1241_v39, %v1240_v26  ;;  %v1283_v5 = vrot.slane %v1282_v54, 1  ;;  %v3259_v22 = vunpack.c.l.b16 %v1408_v7 }
 0x209   :  { %v3261_v28 = vadd.f32 %v1257_v6, %v1256_v59  ;;  %v1245_v60 = vrot.slane %v1244_v48, 2  ;;  %v1297_v25 = vrot.slane %v1195_v16, 4  ;;  %v3263_v24 = vadd.f32 %v1253_v50, %v1252_v44 }
 0x20a   :  { %v3241_v30 = vpop.xlane.xlu1 %1122  ;;  %v1321_v11 = vrot.slane %v1199_v53, 4  ;;  %v3265_v27 = vunpack.c.l.b16 %v1415_v51  ;;  %v1800_v63 = vrot.slane %v3204_v33, %v3196_v31  ;;  %v1413_v52 = vpack.c.bf16 %v1266_v4, %v1266_v4 }
 0x20b   :  { %v3247_v56 = vpop.xlane.xlu0 %1134  ;;  %v1193_v38 = vmul.f32 %v3241_v30, %v3688_v42  ;;  %v1270_v47 = vadd.f32 %v1269_v46, %v1268_v14  ;;  %v1888_v40 = vsel %vm1505_vm2, %v1792_v43, %v1788_v1  ;;  %v3273_v3 = vsel %vm1505_vm2, %v1474_v35, %v1473_v17 }
 0x20c   :  { %v1197_v36 = vmul.f32 %v3247_v56, %v3689_v23  ;;  %v1322_v12 = vadd.f32 %v1321_v11, %v1199_v53  ;;  %v1409_v58 = vpack.c.bf16 %v1242_v20, %v1242_v20  ;;  %v1284_v26 = vadd.f32 %v1283_v5, %v1282_v54 }
 0x20d   :  { %v1285_v57 = vrot.slane %v1193_v38, 4  ;;  %v1259_v8 = vrot.slane %v3261_v28, 1  ;;  %v1246_v41 = vadd.f32 %v1245_v60, %v1244_v48  ;;  %v1298_v59 = vadd.f32 %v1297_v25, %v1195_v16  ;;  %v3692_v48 = vld [vmem:[#allocation11_spill] sm:$0xff]  ;;  %v3693_v25 = vld [vmem:[#allocation17_spill] sm:$0xff] }
 0x20e   :  { %v1132_v62 = vpop.xlane.xlu1 %1131  ;;  %v1309_v10 = vrot.slane %v1197_v36, 4  ;;  %v1889_v55 = vsel %vm1507_vm3, %v1796_v45, %v1888_v40  ;;  %v1323_v2 = vrot.slane %v1322_v12, 2  ;;  %v1804_v44 = vrot.slane %v3241_v30, %v3196_v31 }
 0x20f   :  { %v1286_v21 = vadd.f32 %v1285_v57, %v1193_v38  ;;  %v1196_v34 = vmul.f32 %v1132_v62, %v3691_v37  ;;  %v3282_v32 = vunpack.c.l.b16 %v1413_v52  ;;  %v1271_v1 = vrot.slane %v1270_v47, 1 }
 0x210   :  { %v1812_v14 = vrot.slane %v3223_v9, %v3196_v31  ;;  %v1310_v17 = vadd.f32 %v1309_v10, %v1197_v36  ;;  %v1416_v39 = vpack.c.bf16 %v1284_v26, %v1284_v26  ;;  %v1247_v45 = vrot.slane %v1246_v41, 1  ;;  %v3694_v26 = vld [vmem:[#allocation15_spill] sm:$0xff] }
 0x211   :  { %v3269_v49 = vpop.xlane.xlu0 %1143  ;;  %v1287_v54 = vrot.slane %v1286_v21, 2  ;;  %v1299_v16 = vrot.slane %v1298_v59, 2  ;;  %v1890_v13 = vsel %vm1509_vm4, %v1800_v63, %v1889_v55  ;;  %v1324_v35 = vadd.f32 %v1323_v2, %v1322_v12 }
 0x212   :  { %v1200_v33 = vmul.f32 %v3269_v49, %v3690_v18  ;;  %v1891_v50 = vsel %vm1511_vm5, %v1804_v44, %v1890_v13  ;;  %v1303_v51 = vrot.slane %v1196_v34, 4  ;;  %v1272_v42 = vadd.f32 %v1271_v1, %v1270_v47 }
 0x213   :  { %v1311_v38 = vrot.slane %v1310_v17, 2  ;;  %v1816_v4 = vrot.slane %v1132_v62, %v3196_v31  ;;  %v1288_v11 = vadd.f32 %v1287_v54, %v1286_v21  ;;  %v3295_v23 = vunpack.c.l.b16 %v1409_v58  ;;  %v3695_v54 = vld [vmem:[#allocation19_spill] sm:$0xff] }
 0x214   :  { %v1327_v6 = vrot.slane %v1200_v33, 4  ;;  %v1248_v36 = vadd.f32 %v1247_v45, %v1246_v41  ;;  %v1300_v52 = vadd.f32 %v1299_v16, %v1298_v59  ;;  %v1325_v62 = vrot.slane %v1324_v35, 1 }
 0x215   :  { %v1828_v47 = vrot.slane %v3231_v61, %v3196_v31  ;;  %v1304_v40 = vadd.f32 %v1303_v51, %v1196_v34  ;;  %v1312_v10 = vadd.f32 %v1311_v38, %v1310_v17  ;;  %v3310_v18 = vunpack.c.l.b16 %v1416_v39 }
 0x216   :  { %v1126_v7 = vpop.xlane.xlu1 %1125  ;;  %v1328_v20 = vadd.f32 %v1327_v6, %v1200_v33  ;;  %v1414_v33 = vpack.c.bf16 %v1272_v42, %v1272_v42  ;;  %v1289_v59 = vrot.slane %v1288_v11, 1  ;;  %v1410_v2 = vpack.c.bf16 %v1248_v36, %v1248_v36 }
 0x217   :  { %v1194_v19 = vmul.f32 %v1126_v7, %v3692_v48  ;;  %v1808_v30 = vrot.slane %v1126_v7, %v3196_v31  ;;  %v1820_v61 = vrot.slane %v3247_v56, %v3196_v31  ;;  %v1326_v17 = vadd.f32 %v1325_v62, %v1324_v35 }
 0x218   :  { %v3289_v53 = vpop.xlane.xlu0 %1146  ;;  %v1329_v55 = vrot.slane %v1328_v20, 2  ;;  %v1305_v7 = vrot.slane %v1304_v40, 2  ;;  %v1313_v6 = vrot.slane %v1312_v10, 1  ;;  %v1482_v16 = vunpack.c.l.b16 %v1414_v33 }
 0x219   :  { %v1291_v9 = vrot.slane %v1194_v19, 4  ;;  %v1892_v46 = vsel %vm1513_vm6, %v1808_v30, %v1891_v50  ;;  %v1201_v63 = vmul.f32 %v3289_v53, %v3693_v25  ;;  %v1290_v13 = vadd.f32 %v1289_v59, %v1288_v11  ;;  %v3696_v30 = vld [vmem:[#allocation20_spill] sm:$0xff] }
 0x21a   :  { %v1138_v43 = vpop.xlane.xlu1 %1137  ;;  %v1893_v57 = vsel %vm1515_vm7, %v1812_v14, %v1892_v46  ;;  %v1301_v14 = vrot.slane %v1300_v52, 1  ;;  %v1330_v56 = vadd.f32 %v1329_v55, %v1328_v20  ;;  %v3323_v51 = vunpack.c.l.b16 %v1410_v2  ;;  %v3697_v20 = vld [vmem:[#allocation21_spill] sm:$0xff] }
 0x21b   :  { %v1292_v5 = vadd.f32 %v1291_v9, %v1194_v19  ;;  %v1894_v60 = vsel %vm1517_vm8, %v1816_v4, %v1893_v57  ;;  %v1198_v21 = vmul.f32 %v1138_v43, %v3694_v26  ;;  %v1824_v41 = vrot.slane %v1138_v43, %v3196_v31 }
 0x21c   :  { %v3300_v12 = vpop.xlane.xlu0 %1149  ;;  %1915 = vst.msk [vmem:[%s3626_s3 + $0x8] sm:$0xff] %vm1913_vm9, %v1894_v60  ;;  %v1333_v44 = vrot.slane %v1201_v63, 4  ;;  %v1832_v35 = vrot.slane %v3269_v49, %v3196_v31  ;;  %v3327_v38 = vadd.f32 %v1301_v14, %v1300_v52  ;;  %v1423_v4 = vpack.c.bf16 %v1326_v17, %v1326_v17  ;;  %v3699_v17 = vld [vmem:[#allocation22_spill] sm:$0xff] }
 0x21d   :  { %v1293_v58 = vrot.slane %v1292_v5, 2  ;;  %v1315_v37 = vrot.slane %v1198_v21, 4  ;;  %v1202_v39 = vmul.f32 %v3300_v12, %v3695_v54  ;;  %v1895_v45 = vsel %vm1505_vm2, %v1824_v41, %v1820_v61  ;;  %v3698_v41 = vld [vmem:[#allocation16_spill] sm:$0xff] }
 0x21e   :  { %v3314_v34 = vpop.xlane.xlu1 %1164  ;;  %v1334_v9 = vadd.f32 %v1333_v44, %v1201_v63  ;;  %v1896_v46 = vsel %vm1507_vm3, %v1828_v47, %v1895_v45  ;;  %v3330_v57 = vadd.f32 %v1305_v7, %v1304_v40  ;;  %v3336_v25 = vsel %vm1505_vm2, %v1482_v16, %v3282_v32 }
 0x21f   :  { %v1294_v48 = vadd.f32 %v1293_v58, %v1292_v5  ;;  %v1316_v19 = vadd.f32 %v1315_v37, %v1198_v21  ;;  %v1207_v50 = vmul.f32 %v3314_v34, %v3696_v30  ;;  %v1339_v43 = vrot.slane %v1202_v39, 4 }
 0x220   :  { %v3316_v1 = vpop.xlane.xlu0 %1158  ;;  %v1314_v5 = vadd.f32 %v1313_v6, %v1312_v10  ;;  %v1417_v49 = vpack.c.bf16 %v1290_v13, %v1290_v13  ;;  %v1331_v63 = vrot.slane %v1330_v56, 1  ;;  %v1335_v62 = vrot.slane %v1334_v9, 2 }
 0x221   :  { %v1317_v42 = vrot.slane %v1316_v19, 2  ;;  %v1295_v11 = vrot.slane %v1294_v48, 1  ;;  %v1205_v36 = vmul.f32 %v3316_v1, %v3697_v20  ;;  %v1369_v52 = vrot.slane %v1207_v50, 4 }
 0x222   :  { %v1897_v47 = vsel %vm1509_vm4, %v1832_v35, %v1896_v46  ;;  %v3339_v10 = vunpack.c.l.b16 %v1423_v4  ;;  %v1836_v40 = vrot.slane %v3289_v53, %v3196_v31  ;;  %v1340_v21 = vadd.f32 %v1339_v43, %v1202_v39 }
 0x223   :  { %v1318_v58 = vadd.f32 %v1317_v42, %v1316_v19  ;;  %v1357_v26 = vrot.slane %v1205_v36, 4  ;;  %v1421_v32 = vpack.c.bf16 %v1314_v5, %v1314_v5  ;;  %v1307_v55 = vrot.slane %v3330_v57, 1  ;;  %v3700_v42 = vld [vmem:[#allocation18_spill] sm:$0xff] }
 0x224   :  { %v1296_v2 = vadd.f32 %v1295_v11, %v1294_v48  ;;  %v1898_v44 = vsel %vm1511_vm5, %v1836_v40, %v1897_v47  ;;  %v1370_v37 = vadd.f32 %v1369_v52, %v1207_v50  ;;  %v3351_v53 = vadd.f32 %v1331_v63, %v1330_v56  ;;  %v3701_v40 = vld [vmem:[#allocation23_spill] sm:$0xff] }
 0x225   :  { %v1358_v61 = vadd.f32 %v1357_v26, %v1205_v36  ;;  %v1336_v39 = vadd.f32 %v1335_v62, %v1334_v9  ;;  %v1319_v6 = vrot.slane %v1318_v58, 1  ;;  %v1840_v19 = vrot.slane %v3300_v12, %v3196_v31 }
 0x226   :  { %v1153_v60 = vpop.xlane.xlu0 %1152  ;;  %v1341_v45 = vrot.slane %v1340_v21, 2  ;;  %v3355_v35 = vunpack.c.l.b16 %v1417_v49  ;;  %v1418_v56 = vpack.c.bf16 %v1296_v2, %v1296_v2  ;;  %v1371_v43 = vrot.slane %v1370_v37, 2  ;;  %v3702_v2 = vld [vmem:[#allocation24_spill] sm:$0xff] }
 0x227   :  { %v1203_v33 = vmul.f32 %v1153_v60, %v3698_v41  ;;  %v1844_v14 = vrot.slane %v1153_v60, %v3196_v31  ;;  %v1359_v16 = vrot.slane %v1358_v61, 2  ;;  %v1899_v50 = vsel %vm1513_vm6, %v1840_v19, %v1898_v44 }
 0x228   :  { %v3361_v11 = vunpack.c.l.b16 %v1421_v32  ;;  %v1337_v12 = vrot.slane %v1336_v39, 1  ;;  %v1320_v20 = vadd.f32 %v1319_v6, %v1318_v58  ;;  %v1424_v60 = vpack.c.bf16 %v3351_v53, %v3351_v53 }
 0x229   :  { %v3344_v59 = vpop.xlane.xlu1 %1167  ;;  %v1345_v48 = vrot.slane %v1203_v33, 4  ;;  %v1900_v9 = vsel %vm1515_vm7, %v1844_v14, %v1899_v50  ;;  %v3366_v49 = vadd.f32 %v1341_v45, %v1340_v21  ;;  %v1360_v63 = vadd.f32 %v1359_v16, %v1358_v61 }
 0x22a   :  { %v1208_v7 = vmul.f32 %v3344_v59, %v3699_v17  ;;  %v1156_v54 = vpop.xlane.xlu0 %1155  ;;  %v1860_v47 = vrot.slane %v3314_v34, %v3196_v31  ;;  %v1852_v58 = vrot.slane %v3316_v1, %v3196_v31  ;;  %v1486_v21 = vunpack.c.l.b16 %v1418_v56 }
 0x22b   :  { %v1204_v4 = vmul.f32 %v1156_v54, %v3700_v42  ;;  %v1848_v46 = vrot.slane %v1156_v54, %v3196_v31  ;;  %v1346_v52 = vadd.f32 %v1345_v48, %v1203_v33  ;;  %v3379_v32 = vadd.f32 %v1371_v43, %v1370_v37 }
 0x22c   :  { %v1375_v13 = vrot.slane %v1208_v7, 4  ;;  %v3383_v44 = vadd.f32 %v1337_v12, %v1336_v39  ;;  %v1422_v14 = vpack.c.bf16 %v1320_v20, %v1320_v20  ;;  %v1343_v34 = vrot.slane %v3366_v49, 1 }
 0x22d   :  { %v1162_v30 = vpop.xlane.xlu1 %1161  ;;  %v1901_v36 = vsel %vm1517_vm8, %v1848_v46, %v1900_v9  ;;  %v1351_v26 = vrot.slane %v1204_v4, 4  ;;  %v1361_v54 = vrot.slane %v1360_v63, 1  ;;  %v1347_v1 = vrot.slane %v1346_v52, 2 }
 0x22e   :  { %v1376_v5 = vadd.f32 %v1375_v13, %v1208_v7  ;;  %1916 = vst.msk [vmem:[%s3626_s3 + $0x10] sm:$0xff] %vm1913_vm9, %v1901_v36  ;;  %v1206_v41 = vmul.f32 %v1162_v30, %v3701_v40  ;;  %v1856_v7 = vrot.slane %v1162_v30, %v3196_v31  ;;  %v1260_v6 = vadd.f32 %v1259_v8, %v3261_v28 }
 0x22f   :  { %v1352_v19 = vadd.f32 %v1351_v26, %v1204_v4  ;;  %v1308_v48 = vadd.f32 %v1307_v55, %v3330_v57  ;;  %v1373_v39 = vrot.slane %v3379_v32, 1  ;;  %v1864_v30 = vrot.slane %v3344_v59, %v3196_v31 }
 0x230   :  { %v1377_v33 = vrot.slane %v1376_v5, 2  ;;  %v1363_v17 = vrot.slane %v1206_v41, 4  ;;  %v1411_v50 = vpack.c.bf16 %v3263_v24, %v3263_v24  ;;  %v1490_v42 = vunpack.c.l.b16 %v1422_v14 }
 0x231   :  { %v3372_v62 = vpop.xlane.xlu1 %1176  ;;  %v1902_v28 = vsel %vm1505_vm2, %v1856_v7, %v1852_v58  ;;  %v3399_v4 = vadd.f32 %v1361_v54, %v1360_v63  ;;  %v3401_v56 = vadd.f32 %v1347_v1, %v1346_v52  ;;  %v1412_v57 = vpack.c.bf16 %v1260_v6, %v1260_v6  ;;  %v3704_v6 = vld [vmem:[#allocation27_spill] sm:$0xff] }
 0x232   :  { %v1211_v61 = vmul.f32 %v3372_v62, %v3702_v2  ;;  %v1364_v45 = vadd.f32 %v1363_v17, %v1206_v41  ;;  %v3392_v13 = vadd.f32 %v1377_v33, %v1376_v5  ;;  %v1419_v55 = vpack.c.bf16 %v3327_v38, %v3327_v38 }
 0x233   :  { %v1353_v43 = vrot.slane %v1352_v19, 2  ;;  %v1876_v59 = vrot.slane %v3372_v62, %v3196_v31  ;;  %v1420_v5 = vpack.c.bf16 %v1308_v48, %v1308_v48  ;;  %v1903_v20 = vsel %vm1507_vm3, %v1860_v47, %v1902_v28 }
 0x234   :  { %v1393_v16 = vrot.slane %v1211_v61, 4  ;;  %v1365_v46 = vrot.slane %v1364_v45, 2  ;;  %v1379_v12 = vrot.slane %v3392_v13, 1  ;;  %v1479_v36 = vunpack.c.l.b16 %v1411_v50 }
 0x235   :  { %v1171_v37 = vpop.xlane.xlu1 %1170  ;;  %v1508_v63 = vsel %vm1507_vm3, %v3237_v15, %v3273_v3  ;;  %v1520_v62 = vsel %vm1507_vm3, %v3265_v27, %v3336_v25  ;;  %v1480_v26 = vunpack.c.l.b16 %v1412_v57  ;;  %v1487_v40 = vunpack.c.l.b16 %v1419_v55  ;;  %v3703_v25 = vld [vmem:[#allocation25_spill] sm:$0xff] }
 0x236   :  { %v1394_v8 = vadd.f32 %v1393_v16, %v1211_v61  ;;  %v1366_v9 = vadd.f32 %v1365_v46, %v1364_v45  ;;  %v1510_v38 = vsel %vm1509_vm4, %v3259_v22, %v1508_v63  ;;  %v1521_v47 = vsel %vm1509_vm4, %v3310_v18, %v1520_v62  ;;  %v3705_v46 = vld [vmem:[#allocation26_spill] sm:$0xff] }
 0x237   :  { %v1512_v41 = vsel %vm1511_vm5, %v3295_v23, %v1510_v38  ;;  %v1488_v2 = vunpack.c.l.b16 %v1420_v5  ;;  %v1522_v22 = vsel %vm1511_vm5, %v3355_v35, %v1521_v47  ;;  %v1209_v61 = vmul.f32 %v1171_v37, %v3703_v25 }
 0x238   :  { %v1367_v52 = vrot.slane %v1366_v9, 1  ;;  %v1395_v58 = vrot.slane %v1394_v8, 2  ;;  %v1514_v15 = vsel %vm1513_vm6, %v3323_v51, %v1512_v41  ;;  %v1523_v27 = vsel %vm1513_vm6, %v1486_v21, %v1522_v22 }
 0x239   :  { %v1174_v24 = vpop.xlane.xlu1 %1173  ;;  %v1516_v3 = vsel %vm1515_vm7, %v1479_v36, %v1514_v15  ;;  %v1868_v14 = vrot.slane %v1171_v37, %v3196_v31  ;;  %v1354_v23 = vadd.f32 %v1353_v43, %v1352_v19  ;;  %v1524_v18 = vsel %vm1515_vm7, %v1487_v40, %v1523_v27 }
 0x23a   :  { %v1368_v33 = vadd.f32 %v1367_v52, %v1366_v9  ;;  %v1396_v17 = vadd.f32 %v1395_v58, %v1394_v8  ;;  %v1904_v7 = vsel %vm1509_vm4, %v1864_v30, %v1903_v20  ;;  %v1518_v51 = vsel %vm1517_vm8, %v1480_v26, %v1516_v3 }
 0x23b   :  { %v1525_v1 = vsel %vm1517_vm8, %v1488_v2, %v1524_v18  ;;  %v1381_v35 = vrot.slane %v1209_v61, 4  ;;  %v1210_v45 = vmul.f32 %v1174_v24, %v3704_v6  ;;  %v1905_v48 = vsel %vm1511_vm5, %v1868_v14, %v1904_v7 }
 0x23c   :  { %v1430_v16 = vpack.c.bf16 %v1368_v33, %v1368_v33  ;;  %v1540_v21 = vpack.c.b16 %v1525_v1, %v1518_v51  ;;  %v1872_v37 = vrot.slane %v1174_v24, %v3196_v31  ;;  %v1526_v8 = vsel %vm1505_vm2, %v1490_v42, %v3361_v11 }
 0x23d   :  { %v1180_v54 = vpop.xlane.xlu1 %1179  ;;  %v1382_v19 = vadd.f32 %v1381_v35, %v1209_v61  ;;  %v1387_v50 = vrot.slane %v1210_v45, 4  ;;  %v1374_v57 = vadd.f32 %v1373_v39, %v3379_v32  ;;  %v1349_v55 = vrot.slane %v3401_v56, 1 }
 0x23e   :  { %v1212_v28 = vmul.f32 %v1180_v54, %v3705_v46  ;;  %v1880_v30 = vrot.slane %v1180_v54, %v3196_v31  ;;  %2401 = vmatprep.mubr.bf16.mxu1 %v1540_v21  ;;  %v1906_v43 = vsel %vm1513_vm6, %v1872_v37, %v1905_v48  ;;  %v1429_v9 = vpack.c.bf16 %v3399_v4, %v3399_v4 }
 0x23f   :  { %v1383_v5 = vrot.slane %v1382_v19, 2  ;;  %v1388_v24 = vadd.f32 %v1387_v50, %v1210_v45  ;;  %v1907_v20 = vsel %vm1515_vm7, %v1876_v59, %v1906_v43  ;;  %v1380_v36 = vadd.f32 %v1379_v12, %v3392_v13 }
 0x240   :  { %v1355_v31 = vrot.slane %v1354_v23, 1  ;;  %v1399_v63 = vrot.slane %v1212_v28, 4  ;;  %v1908_v11 = vsel %vm1517_vm8, %v1880_v30, %v1907_v20  ;;  %v1498_v42 = vunpack.c.l.b16 %v1430_v16 }
 0x241   :  { %v1397_v32 = vrot.slane %v1396_v17, 1  ;;  %v1384_v39 = vadd.f32 %v1383_v5, %v1382_v19  ;;  %v1389_v52 = vrot.slane %v1388_v24, 2  ;;  %1917 = vst.msk [vmem:[%s3626_s3 + $0x18] sm:$0xff] %vm1913_vm9, %v1908_v11  ;;  %v1425_v4 = vpack.c.bf16 %v3383_v44, %v3383_v44  ;;  %v3479_v5 = vld [vmem:[%s3625_s2 + $0x18] sm:$0xf] }
 0x242   :  { %v1344_v13 = vadd.f32 %v1343_v34, %v3366_v49  ;;  %v1431_v59 = vpack.c.bf16 %v1374_v57, %v1374_v57  ;;  %v1400_v12 = vadd.f32 %v1399_v63, %v1212_v28  ;;  %v1497_v58 = vunpack.c.l.b16 %v1429_v9 }
 0x243   :  { %v1350_v38 = vadd.f32 %v1349_v55, %v3401_v56  ;;  %v1385_v62 = vrot.slane %v1384_v39, 1  ;;  %v1390_v26 = vadd.f32 %v1389_v52, %v1388_v24  ;;  %v1527_v40 = vsel %vm1507_vm3, %v3339_v10, %v1526_v8 }
 0x244   :  { %v1432_v41 = vpack.c.bf16 %v1380_v36, %v1380_v36  ;;  %v1356_v47 = vadd.f32 %v1355_v31, %v1354_v23  ;;  %v1401_v33 = vrot.slane %v1400_v12, 2  ;;  %v1533_v2 = vsel %vm1505_vm2, %v1498_v42, %v1497_v58 }
 0x245   :  { %v1398_v44 = vadd.f32 %v1397_v32, %v1396_v17  ;;  %v1386_v15 = vadd.f32 %v1385_v62, %v1384_v39  ;;  %v1391_v22 = vrot.slane %v1390_v26, 1  ;;  %v1492_v49 = vunpack.c.l.b16 %v1424_v60 }
 0x246   :  { %v1493_v34 = vunpack.c.l.b16 %v1425_v4  ;;  %v1499_v3 = vunpack.c.l.b16 %v1431_v59  ;;  %v1402_v56 = vadd.f32 %v1401_v33, %v1400_v12  ;;  %v1426_v27 = vpack.c.bf16 %v1344_v13, %v1344_v13 }
 0x247   :  { %v1427_v25 = vpack.c.bf16 %v1350_v38, %v1350_v38  ;;  %v1433_v61 = vpack.c.bf16 %v1386_v15, %v1386_v15  ;;  %v1392_v14 = vadd.f32 %v1391_v22, %v1390_v26  ;;  %v1428_v10 = vpack.c.bf16 %v1356_v47, %v1356_v47 }
 0x248   :  { %v1534_v23 = vsel %vm1507_vm3, %v1499_v3, %v1533_v2  ;;  %v1403_v18 = vrot.slane %v1402_v56, 1  ;;  %v1528_v7 = vsel %vm1509_vm4, %v1492_v49, %v1527_v40  ;;  %v1500_v17 = vunpack.c.l.b16 %v1432_v41 }
 0x249   :  { %v1435_v54 = vpack.c.bf16 %v1398_v44, %v1398_v44  ;;  %v1501_v51 = vunpack.c.l.b16 %v1433_v61  ;;  %v1434_v1 = vpack.c.bf16 %v1392_v14, %v1392_v14  ;;  %v1495_v53 = vunpack.c.l.b16 %v1427_v25 }
 0x24a   :  { %v1404_v35 = vadd.f32 %v1403_v18, %v1402_v56  ;;  %v1529_v6 = vsel %vm1511_vm5, %v1493_v34, %v1528_v7  ;;  %v1535_v45 = vsel %vm1509_vm4, %v1500_v17, %v1534_v23  ;;  %v1494_v16 = vunpack.c.l.b16 %v1426_v27 }
 0x24b   :  { %v1502_v60 = vunpack.c.l.b16 %v1434_v1  ;;  %v1496_v21 = vunpack.c.l.b16 %v1428_v10  ;;  %v1536_v37 = vsel %vm1511_vm5, %v1501_v51, %v1535_v45  ;;  %v1503_v19 = vunpack.c.l.b16 %v1435_v54  ;;  %v2463_v54 = vld [vmem:[%s3623_s1 + $0x20] sm:$0xff]   ;;  %v2464_v51 = vld [vmem:[%s3623_s1 + $0x28] sm:$0xff]  }
 0x24c   :  { %v1436_v48 = vpack.c.bf16 %v1404_v35, %v1404_v35  ;;  %v1530_v28 = vsel %vm1513_vm6, %v1494_v16, %v1529_v6  ;;  %v1439_v9 = vsub.s32 1, %v3186_v0  ;;  %v1643_v24 = vsub.s32 0, %v3186_v0  ;;  %2405 = vmatprep.subr.bf16.mxu1 %v2463_v54 }
 0x24d   :  { %v1537_v50 = vsel %vm1513_vm6, %v1502_v60, %v1536_v37  ;;  %v1531_v30 = vsel %vm1515_vm7, %v1495_v53, %v1530_v28 }
 0x24e   :  { %v1504_v46 = vunpack.c.l.b16 %v1436_v48  ;;  %v1538_v8 = vsel %vm1515_vm7, %v1503_v19, %v1537_v50  ;;  %v1532_v57 = vsel %vm1517_vm8, %v1496_v21, %v1531_v30  ;;  %v1440_v20 = vrot.slane %v3479_v5, %v1439_v9 }
 0x24f   :  { %v1644_v31 = vrot.slane %v3479_v5, %v1643_v24  ;;  %v1713_v30 = vsub.s32 3, %v3186_v0 }
 0x250   :  { %v1539_v55 = vsel %vm1517_vm8, %v1504_v46, %v1538_v8  ;;  %v1705_v46 = vsub.s32 2, %v3186_v0 }
 0x251   :  { %v1541_v43 = vpack.c.b16 %v1539_v55, %v1532_v57 }
 0x252   :  { %v1706_v28 = vrot.slane %v3479_v5, %v1705_v46 }
 0x253   :  { %2402 = vmatmul.mubr.bf16.vlgmr.msra.gmra.mrb[0].mxu1 %v1541_v43  ;;  %v1714_v43 = vrot.slane %v3479_v5, %v1713_v30  ;;  %v2465_v5 = vld [vmem:[%s3623_s1 + $0x70] sm:$0xff]  }
 0x254   :  { %2406 = vmatpush3.bf16.msra.mxu1 %v2463_v54 }
 0x255   :  { %2407 = vmatprep.subr.bf16.mxu1 %v2464_v51 }
 0x258   :  { %2408 = vmatpush3.bf16.msra.mxu1 %v2464_v51 }
 0x326   :  { %v2403_v36 = vpop.f32.mrb[0].mxu1 }
 0x327   :  { %v1626_v63 = vpop.f32.mrb[1].mxu1  ;;  %v1635_v11 = vadd.f32 %v2403_v36, %v1440_v20 }
 0x328   :  { %v1627_v42 = vadd.f32 %v1626_v63, %v1440_v20  ;;  %v2404_v32 = vpop.f32.mrb[2].mxu1 }
 0x329   :  { %v1629_v39 = vpop.f32.mrb[3].mxu1  ;;  %v1638_v52 = vadd.f32 %v2404_v32, %v1440_v20  ;;  %v1647_v58 = vadd.f32 %v1644_v31, %v1635_v11 }
 0x32a   :  { %v1630_v4 = vadd.f32 %v1629_v39, %v1440_v20  ;;  %v1645_v13 = vadd.f32 %v1644_v31, %v1627_v42 }
 0x32b   :  { %v1648_v62 = vadd.f32 %v1644_v31, %v1638_v52  ;;  %v1656_v26 = vsel %vm1649_vm10, %v1647_v58, 0.0 }
 0x32c   :  { %v1650_v59 = vsel %vm1649_vm10, %v1645_v13, 0.0  ;;  %v1646_v12 = vadd.f32 %v1644_v31, %v1630_v4 }
 0x32d   :  { %1651 = vadd.xlane.f32.xlu0 %v1650_v59  ;;  %v1659_v40 = vsel %vm1649_vm10, %v1648_v62, 0.0 }
 0x32e   :  { %v1653_v38 = vsel %vm1649_vm10, %v1646_v12, 0.0 }
 0x32f   :  { %1654 = vadd.xlane.f32.xlu1 %v1653_v38 }
 0x331   :  { %1657 = vadd.xlane.f32.xlu0 %v1656_v26  ;;  %v62_v26 = vld [vmem:[%s3625_s2 + $0x8] sm:$0xff] }
 0x333   :  { %1660 = vadd.xlane.f32.xlu1 %v1659_v40 }
 0x3ba   :  { %v1652_v41 = vpop.xlane.xlu0 %1651 }
 0x3bb   :  { %v1663_v47 = vmul.f32 0.03125, %v1652_v41  ;;  %v63_v41 = vld [vmem:[%s3625_s2 + $0x10] sm:$0xff] }
 0x3bc   :  { %v1655_v33 = vpop.xlane.xlu1 %1654 }
 0x3bd   :  { %v1667_v2 = vsub.f32 %v1645_v13, %v1663_v47  ;;  %v1664_v44 = vmul.f32 0.03125, %v1655_v33 }
 0x3be   :  { %v1658_v15 = vpop.xlane.xlu0 %1657 }
 0x3bf   :  { %v1668_v22 = vsub.f32 %v1646_v12, %v1664_v44  ;;  %v1665_v49 = vmul.f32 0.03125, %v1658_v15  ;;  %v1671_v34 = vmul.f32 %v1667_v2, %v1667_v2 }
 0x3c0   :  { %v1661_v3 = vpop.xlane.xlu1 %1660 }
 0x3c1   :  { %v1669_v56 = vsub.f32 %v1647_v58, %v1665_v49  ;;  %v1666_v27 = vmul.f32 0.03125, %v1661_v3  ;;  %v1675_v25 = vsel %vm1649_vm10, %v1671_v34, 0.0  ;;  %v1672_v61 = vmul.f32 %v1668_v22, %v1668_v22 }
 0x3c2   :  { %1676 = vadd.xlane.f32.xlu0 %v1675_v25 }
 0x3c3   :  { %v1670_v14 = vsub.f32 %v1648_v62, %v1666_v27  ;;  %v1678_v10 = vsel %vm1649_vm10, %v1672_v61, 0.0  ;;  %v1673_v23 = vmul.f32 %v1669_v56, %v1669_v56  ;;  %v2623_v62 = vmov 0.0  }
 0x3c4   :  { %1679 = vadd.xlane.f32.xlu1 %v1678_v10  ;;  %2413 = vmatprep.subr.bf16.mxu1 %v2623_v62  ;;  %2207 = vst [vmem:[%s3627_s4] sm:$0x3] %v2623_v62 }
 0x3c5   :  { %v1681_v18 = vsel %vm1649_vm10, %v1673_v23, 0.0  ;;  %v1674_v7 = vmul.f32 %v1670_v14, %v1670_v14 }
 0x3c6   :  { %1682 = vadd.xlane.f32.xlu0 %v1681_v18 }
 0x3c7   :  { %v1684_v17 = vsel %vm1649_vm10, %v1674_v7, 0.0 }
 0x3c8   :  { %1685 = vadd.xlane.f32.xlu1 %v1684_v17 }
 0x44f   :  { %v1677_v1 = vpop.xlane.xlu0 %1676 }
 0x450   :  { %v1687_v35 = vmul.f32 0.03125, %v1677_v1 }
 0x451   :  { %v1680_v53 = vpop.xlane.xlu1 %1679 }
 0x452   :  { %v1691_v60 = vadd.f32 1e-05, %v1687_v35  ;;  %v1688_v6 = vmul.f32 0.03125, %v1680_v53 }
 0x453   :  { %v1683_v45 = vpop.xlane.xlu0 %1682 }
 0x454   :  { %2601 = vrsqrt.f32 %v1691_v60  ;;  %v1692_v16 = vadd.f32 1e-05, %v1688_v6  ;;  %v1689_v21 = vmul.f32 0.03125, %v1683_v45 }
 0x455   :  { %v1686_v48 = vpop.xlane.xlu1 %1685 }
 0x456   :  { %2603 = vrsqrt.f32 %v1692_v16  ;;  %v1693_v37 = vadd.f32 1e-05, %v1689_v21  ;;  %v1690_v19 = vmul.f32 0.03125, %v1686_v48 }
 0x458   :  { %2605 = vrsqrt.f32 %v1693_v37  ;;  %v1694_v50 = vadd.f32 1e-05, %v1690_v19 }
 0x45a   :  { %2607 = vrsqrt.f32 %v1694_v50 }
 0x45e   :  { %v2602_v8 = vpop.eup %2601 }
 0x45f   :  { %v1699_v57 = vmul.f32 %v2602_v8, %v1667_v2 }
 0x460   :  { %v2604_v55 = vpop.eup %2603 }
 0x461   :  { %v1700_v20 = vmul.f32 %v2604_v55, %v1668_v22  ;;  %v1707_v36 = vmul.f32 %v1706_v28, %v1699_v57 }
 0x462   :  { %v2606_v31 = vpop.eup %2605 }
 0x463   :  { %v1701_v63 = vmul.f32 %v2606_v31, %v1669_v56  ;;  %v1708_v11 = vmul.f32 %v1706_v28, %v1700_v20  ;;  %v1715_v52 = vadd.f32 %v1714_v43, %v1707_v36 }
 0x464   :  { %v2608_v42 = vpop.eup %2607 }
 0x465   :  { %v1709_v32 = vmul.f32 %v1706_v28, %v1701_v63  ;;  %v1702_v39 = vmul.f32 %v2608_v42, %v1670_v14  ;;  %v1716_v4 = vadd.f32 %v1714_v43, %v1708_v11 }
 0x467   :  { %v1710_v13 = vmul.f32 %v1706_v28, %v1702_v39  ;;  %v1918_v59 = vpack.c.bf16 %v1716_v4, %v1715_v52  ;;  %v1717_v12 = vadd.f32 %v1714_v43, %v1709_v32 }
 0x469   :  { %2409 = vmatprep.mubr.msk.bf16.mxu1 %vm1649_vm10, %v1918_v59  ;;  %v1718_v58 = vadd.f32 %v1714_v43, %v1710_v13 }
 0x46b   :  { %v1919_v38 = vpack.c.bf16 %v1718_v58, %v1717_v12 }
 0x46d   :  { %2410 = vmatmul.mubr.msk.bf16.vlgmr.msra.gmra.mrb[4].mxu1 %vm1649_vm10, %v1919_v38 }
 0x46e   :  { %2414 = vmatpush3.bf16.msra.mxu1 %v2465_v5  ;;  %2429 = vmatprep.mubr.msk.bf16.mxu1 %vm2624_vm11, %v2623_v62 }
 0x46f   :  { %2415 = vmatprep.subr.bf16.mxu1 %v2623_v62 }
 0x540   :  { %v2411_v40 = vpop.f32.mrb[4].mxu1 }
 0x541   :  { %v3523_v47 = vadd.f32 %v2411_v40, %v62_v26  ;;  %v1972_v33 = vpop.f32.mrb[5].mxu1 }
 0x542   :  { %v3525_v2 = vadd.f32 %v1972_v33, %v62_v26  ;;  %v2412_v44 = vpop.f32.mrb[6].mxu1 }
 0x543   :  { %v3527_v15 = vadd.f32 %v2412_v44, %v63_v41  ;;  %v1975_v22 = vpop.f32.mrb[7].mxu1  ;;  %v2000_v34 = vsel %vm444_vm1, %v3523_v47, -inf }
 0x544   :  { %v3529_v49 = vadd.f32 %v1975_v22, %v63_v41  ;;  %v1991_v56 = vsel %vm444_vm1, %v3525_v2, -inf }
 0x545   :  { %v2001_v3 = vsel %vm444_vm1, %v3527_v15, -inf }
 0x546   :  { %v2002_v27 = vmax.f32 %v2000_v34, %v2001_v3  ;;  %v1992_v25 = vsel %vm444_vm1, %v3529_v49, -inf }
 0x547   :  { %v1993_v61 = vmax.f32 %v1991_v56, %v1992_v25 }
 0x548   :  { %v2003_v14 = vrot.slane %v2002_v27, 4 }
 0x549   :  { %v1994_v10 = vrot.slane %v1993_v61, 4 }
 0x54a   :  { %v2004_v23 = vmax.f32 %v2002_v27, %v2003_v14 }
 0x54b   :  { %v1995_v18 = vmax.f32 %v1993_v61, %v1994_v10  ;;  %v2466_v10 = vld [vmem:[%s3623_s1 + $0x78] sm:$0xff]  }
 0x54c   :  { %v2005_v7 = vrot.slane %v2004_v23, 2  ;;  %2416 = vmatpush3.bf16.msra.mxu1 %v2466_v10 }
 0x54d   :  { %v1996_v17 = vrot.slane %v1995_v18, 2  ;;  %2417 = vmatprep.subr.bf16.mxu1 %v2623_v62 }
 0x54e   :  { %v2006_v54 = vmax.f32 %v2004_v23, %v2005_v7  ;;  %v2467_v23 = vld [vmem:[%s3623_s1 + $0x80] sm:$0xff]   ;;  %v2469_v7 = vld [vmem:[%s3623_s1 + $0x90] sm:$0xff]  }
 0x54f   :  { %v1997_v51 = vmax.f32 %v1995_v18, %v1996_v17  ;;  %v2468_v18 = vld [vmem:[%s3623_s1 + $0x88] sm:$0xff]   ;;  %v2470_v17 = vld [vmem:[%s3623_s1 + $0x98] sm:$0xff]  }
 0x550   :  { %v2007_v1 = vrot.slane %v2006_v54, 1  ;;  %2418 = vmatpush3.bf16.msra.mxu1 %v2467_v23 }
 0x551   :  { %v1998_v35 = vrot.slane %v1997_v51, 1  ;;  %2419 = vmatprep.subr.bf16.mxu1 %v2623_v62 }
 0x552   :  { %v2008_v53 = vmax.f32 %v2006_v54, %v2007_v1  ;;  %v2471_v54 = vld [vmem:[%s3623_s1 + $0xa0] sm:$0xff]   ;;  %v2218_v1 = vadd.s32 4294967256, %v3188_v29 }
 0x553   :  { %v1999_v60 = vmax.f32 %v1997_v51, %v1998_v35  ;;  %v2472_v51 = vld [vmem:[%s3623_s1 + $0xa8] sm:$0xff]   ;;  %v2213_v35 = vadd.s32 4294967264, %v3188_v29 }
 0x554   :  { %v2011_v6 = vsub.f32 %v3523_v47, %v2008_v53  ;;  %v2012_v45 = vsub.f32 %v3527_v15, %v2008_v53  ;;  %2420 = vmatpush3.bf16.msra.mxu1 %v2468_v18  ;;  %v3582_v53 = vsub.s32 %v2218_v1, %v3186_v0 }
 0x555   :  { %v2009_v16 = vsub.f32 %v3525_v2, %v1999_v60  ;;  %v2010_v21 = vsub.f32 %v3529_v49, %v1999_v60  ;;  %2421 = vmatprep.subr.bf16.mxu1 %v2623_v62  ;;  %v3585_v60 = vsub.s32 %v2213_v35, %v3186_v0 }
 0x556   :  { %v2017_v48 = vmul.f32 1.442695, %v2011_v6  ;;  %v2019_v37 = vmul.f32 1.442695, %v2012_v45 }
 0x557   :  { %v2013_v19 = vmul.f32 1.442695, %v2009_v16  ;;  %v2015_v50 = vmul.f32 1.442695, %v2010_v21 }
 0x558   :  { %2609 = vpow2.f32 %v2017_v48  ;;  %2422 = vmatpush3.bf16.msra.mxu1 %v2469_v7 }
 0x559   :  { %2611 = vpow2.f32 %v2019_v37  ;;  %2423 = vmatprep.subr.bf16.mxu1 %v2623_v62 }
 0x55a   :  { %2613 = vpow2.f32 %v2013_v19 }
 0x55b   :  { %2615 = vpow2.f32 %v2015_v50 }
 0x55c   :  { %2424 = vmatpush3.bf16.msra.mxu1 %v2470_v17 }
 0x55d   :  { %2425 = vmatprep.subr.bf16.mxu1 %v2623_v62 }
 0x560   :  { %2426 = vmatpush3.bf16.msra.mxu1 %v2471_v54 }
 0x561   :  { %2427 = vmatprep.subr.bf16.mxu1 %v2623_v62 }
 0x562   :  { %v2610_v28 = vpop.eup %2609 }
 0x563   :  { %v2612_v8 = vpop.eup %2611  ;;  %v2030_v57 = vsel %vm444_vm1, %v2610_v28, 0.0 }
 0x564   :  { %v2614_v55 = vpop.eup %2613  ;;  %v2031_v43 = vsel %vm444_vm1, %v2612_v8, 0.0  ;;  %2428 = vmatpush3.bf16.msra.mxu1 %v2472_v51 }
 0x565   :  { %v2616_v20 = vpop.eup %2615  ;;  %v2021_v36 = vsel %vm444_vm1, %v2614_v55, 0.0  ;;  %v2032_v31 = vadd.f32 %v2031_v43, %v2030_v57 }
 0x566   :  { %v2022_v63 = vsel %vm444_vm1, %v2616_v20, 0.0 }
 0x567   :  { %v2023_v11 = vadd.f32 %v2022_v63, %v2021_v36  ;;  %v2033_v42 = vrot.slane %v2032_v31, 4 }
 0x569   :  { %v2024_v32 = vrot.slane %v2023_v11, 4  ;;  %v2034_v39 = vadd.f32 %v2033_v42, %v2032_v31 }
 0x56b   :  { %v2025_v52 = vadd.f32 %v2024_v32, %v2023_v11  ;;  %v2035_v4 = vrot.slane %v2034_v39, 2 }
 0x56d   :  { %v2026_v13 = vrot.slane %v2025_v52, 2  ;;  %v2036_v59 = vadd.f32 %v2035_v4, %v2034_v39 }
 0x56f   :  { %v2027_v12 = vadd.f32 %v2026_v13, %v2025_v52  ;;  %v2037_v58 = vrot.slane %v2036_v59, 1 }
 0x571   :  { %v2028_v38 = vrot.slane %v2027_v12, 1  ;;  %v2038_v5 = vadd.f32 %v2037_v58, %v2036_v59 }
 0x573   :  { %v2029_v26 = vadd.f32 %v2028_v38, %v2027_v12  ;;  %2617 = vrcp.f32 %v2038_v5 }
 0x575   :  { %2619 = vrcp.f32 %v2029_v26 }
 0x57d   :  { %v2618_v40 = vpop.eup %2617 }
 0x57e   :  { %v2042_v44 = vmul.f32 0.25, %v2618_v40 }
 0x57f   :  { %v2620_v41 = vpop.eup %2619 }
 0x580   :  { %v2040_v33 = vmul.f32 0.25, %v2620_v41  ;;  %v2046_v27 = vmul.f32 %v2612_v8, %v2042_v44  ;;  %v2045_v25 = vmul.f32 %v2610_v28, %v2042_v44 }
 0x582   :  { %v2044_v22 = vmul.f32 %v2616_v20, %v2040_v33  ;;  %v2043_v34 = vmul.f32 %v2614_v55, %v2040_v33  ;;  %v2056_v61 = vsel %vm444_vm1, %v2046_v27, 0.0  ;;  %v2053_v14 = vsel %vm444_vm1, %v2045_v25, 0.0 }
 0x584   :  { %v2050_v3 = vsel %vm444_vm1, %v2044_v22, 0.0  ;;  %v2047_v56 = vsel %vm444_vm1, %v2043_v34, 0.0 }
 0x585   :  { %2051 = vadd.xlane.f32.xlu1 %v2050_v3  ;;  %2048 = vadd.xlane.f32.xlu0 %v2047_v56 }
 0x589   :  { %2057 = vadd.xlane.f32.xlu1 %v2056_v61  ;;  %2054 = vadd.xlane.f32.xlu0 %v2053_v14 }
 0x612   :  { %v2052_v6 = vpop.xlane.xlu1 %2051  ;;  %v2049_v45 = vpop.xlane.xlu0 %2048 }
 0x613   :  { %v2060_v16 = vmul.f32 %v2052_v6, %v3529_v49  ;;  %v2222_v21 = vrot.slane %v2052_v6, %v3582_v53  ;;  %v2059_v48 = vmul.f32 %v2049_v45, %v3525_v2  ;;  %v2217_v37 = vrot.slane %v2049_v45, %v3585_v60 }
 0x615   :  { %v2063_v19 = vadd.f32 %v2060_v16, %v2059_v48  ;;  %v2224_v29 = vsel %vm2223_vm12, %v2222_v21, %v2217_v37 }
 0x616   :  { %v2058_v50 = vpop.xlane.xlu1 %2057  ;;  %v2055_v28 = vpop.xlane.xlu0 %2054 }
 0x617   :  { %v2064_v8 = vrot.slane %v2063_v19, 4  ;;  %v2062_v57 = vmul.f32 %v2058_v50, %v3527_v15  ;;  %v2061_v55 = vmul.f32 %v2055_v28, %v3523_v47  ;;  %v65_v47 = vld [vmem:[%s3625_s2 + $0x20] sm:$0xf]  ;;  %v2232_v18 = vrot.slane %v2058_v50, %v3582_v53 }
 0x618   :  { %v2082_v38 = vrot.slane %v65_v47, %v1439_v9  ;;  %v2181_v5 = vrot.slane %v65_v47, %v1643_v24  ;;  %v2200_v10 = vrot.slane %v65_v47, %v1705_v46  ;;  %v2228_v7 = vrot.slane %v2055_v28, %v3585_v60 }
 0x619   :  { %v2065_v43 = vadd.f32 %v2064_v8, %v2063_v19  ;;  %v2070_v20 = vadd.f32 %v2062_v57, %v2061_v55  ;;  %v2205_v62 = vrot.slane %v65_v47, %v1713_v30 }
 0x61a   :  { %v2233_v51 = vsel %vm2223_vm12, %v2232_v18, %v2228_v7 }
 0x61b   :  { %v2066_v36 = vrot.slane %v2065_v43, 2  ;;  %v2071_v49 = vrot.slane %v2070_v20, 4  ;;  %v2234_v35 = vsel %vm1505_vm2, %v2233_v51, %v2224_v29 }
 0x61d   :  { %v2067_v31 = vadd.f32 %v2066_v36, %v2065_v43  ;;  %v2072_v63 = vadd.f32 %v2071_v49, %v2070_v20 }
 0x61f   :  { %v2068_v11 = vrot.slane %v2067_v31, 1  ;;  %v2073_v2 = vrot.slane %v2072_v63, 2 }
 0x621   :  { %v2069_v42 = vadd.f32 %v2068_v11, %v2067_v31  ;;  %v2074_v32 = vadd.f32 %v2073_v2, %v2072_v63 }
 0x623   :  { %v2075_v39 = vrot.slane %v2074_v32, 1  ;;  %v2077_v52 = vpack.c.bf16 %v2069_v42, %v2069_v42 }
 0x625   :  { %v2076_v4 = vadd.f32 %v2075_v39, %v2074_v32  ;;  %v2085_v59 = vunpack.c.l.b16 %v2077_v52 }
 0x627   :  { %v2078_v13 = vpack.c.bf16 %v2076_v4, %v2076_v4 }
 0x629   :  { %v2086_v12 = vunpack.c.l.b16 %v2078_v13 }
 0x62b   :  { %v2087_v15 = vsel %vm1505_vm2, %v2086_v12, %v2085_v59 }
 0x62c   :  { %v2088_v58 = vpack.c.b16 %v2087_v15, %v2087_v15 }
 0x62e   :  { %2430 = vmatmul.mubr.bf16.vlgmr.msra.gmra.mrb[8].mxu1 %v2088_v58 }
 0x701   :  { %v2172_v26 = vpop.f32.mrb[8].mxu1 }
 0x702   :  { %v2173_v40 = vadd.f32 %v2172_v26, %v2082_v38  ;;  %v2431_v41 = vpop.f32.mrb[9].mxu1 }
 0x703   :  { %v2175_v33 = vpop.f32.mrb[10].mxu1 }
 0x704   :  { %v2432_v44 = vpop.f32.mrb[11].mxu1  ;;  %v2182_v22 = vadd.f32 %v2181_v5, %v2173_v40 }
 0x706   :  { %v2184_v34 = vsel %vm2183_vm13, %v2182_v22, 0.0 }
 0x707   :  { %2185 = vadd.xlane.f32.xlu0 %v2184_v34 }
 0x794   :  { %v2186_v3 = vpop.xlane.xlu0 %2185 }
 0x795   :  { %v2187_v9 = vmul.f32 0.03125, %v2186_v3 }
 0x797   :  { %v2188_v56 = vsub.f32 %v2182_v22, %v2187_v9 }
 0x799   :  { %v2189_v27 = vmul.f32 %v2188_v56, %v2188_v56 }
 0x79b   :  { %v2190_v24 = vsel %vm2183_vm13, %v2189_v27, 0.0 }
 0x79c   :  { %2191 = vadd.xlane.f32.xlu1 %v2190_v24 }
 0x829   :  { %v2192_v25 = vpop.xlane.xlu1 %2191 }
 0x82a   :  { %v2193_v61 = vmul.f32 0.03125, %v2192_v25 }
 0x82c   :  { %v2194_v14 = vadd.f32 1e-05, %v2193_v61 }
 0x82e   :  { %2621 = vrsqrt.f32 %v2194_v14 }
 0x838   :  { %v2622_v23 = vpop.eup %2621 }
 0x839   :  { %v2196_v17 = vmul.f32 %v2622_v23, %v2188_v56 }
 0x83b   :  { %v2201_v54 = vmul.f32 %v2200_v10, %v2196_v17 }
 0x83d   :  { %v2206_v1 = vadd.f32 %v2205_v62, %v2201_v54 }
 0x83f   :  { %2208 = vst.msk [vmem:[%s3627_s4] sm:$0x3] %vm2183_vm13, %v2206_v1 }
 0x840   :  { %2237 = vst.msk [vmem:[%s3627_s4] sm:$0x3] %vm2236_vm14, %v2234_v35 }

</bundles_post_ra>
